<compile_context>
chip_gen: v6e
topology: v6e:2x2x1
jax: 0.10.0
libtpu: 0.0.40
codegen_flags: <defaults>
</compile_context>

<pallas_src>
import functools
import math

import jax
import jax.numpy as jnp
from jax.experimental import pallas as pl
from jax.experimental.pallas import tpu as pltpu

_EPS = 1e-5
_LANE = 128


def _round_up(n, m):
    return ((n + m - 1) // m) * m


def _pad1(v, n):
    return jnp.pad(v, (0, n - v.shape[0]))


def _pad2(w, r, c):
    return jnp.pad(w, ((0, r - w.shape[0]), (0, c - w.shape[1])))


# ---------------------------- the fused kernel ----------------------------

def _nonlocal_flash_kernel(x_q_ref, kv_ref,
                           wt_ref, bt_ref, wpre_ref, bpre_ref, ps_ref, psh_ref,
                           o_ref,
                           theta_s, m_s, acc_s,
                           *, f0_pad, mu_pad, compute_dtype):
    """Grid = (B, n_q, n_k); one (query-tile, key-tile) step per invocation.

    x_q_ref : (TQ, C)              query-tile slice of x (channels-last, true C)
    kv_ref  : (TK, f0_pad+mu_pad)  pre-projected phi|mu key/value tile
    o_ref   : (TQ, C)              output tile (written at the last key tile)
    """
    ki = pl.program_id(2)
    nk = pl.num_programs(2)

    # ---- init: running-softmax state + resident theta for this query tile ----
    @pl.when(ki == 0)
    def _init():
        x_q = x_q_ref[...].astype(compute_dtype)
        th = jnp.maximum(
            jnp.dot(x_q, wt_ref[...], preferred_element_type=jnp.float32)
            + bt_ref[...], 0.0)                                    # (TQ, f0_pad)
        theta_s[...] = th.astype(compute_dtype)
        m_s[...] = jnp.full(m_s.shape, -jnp.inf, m_s.dtype)
        acc_s[...] = jnp.zeros(acc_s.shape, acc_s.dtype)

    # ---- key/value tile (phi|mu projection was hoisted to the wrapper) ----
    kv = kv_ref[...]                               # compute_dtype, lane-dense
    phi = kv[:, :f0_pad]                           # (TK, f0_pad)
    mu = kv[:, f0_pad:]                            # (TK, mu_pad); last col == 1

    # ---- online-softmax attention update ----
    s = jax.lax.dot_general(theta_s[...], phi, (((1,), (1,)), ((), ())),
                            preferred_element_type=jnp.float32)    # (TQ, TK)
    m_prev = m_s[...]
    m_new = jnp.maximum(m_prev, jnp.max(s, axis=-1, keepdims=True))
    alpha = jnp.exp(m_prev - m_new)
    p = jnp.exp(s - m_new)
    # The constant-1 mu column accumulates sum(p) on the MXU, so no explicit
    # cross-lane row-sum (and zero-padded key rows drop out exactly).
    acc_s[...] = alpha * acc_s[...] + jnp.dot(
        p.astype(compute_dtype), mu, preferred_element_type=jnp.float32)
    m_s[...] = m_new

    # ---- finalize: normalize, pre_head, residual, post_head affine + ReLU ----
    @pl.when(ki == nk - 1)
    def _finalize():
        acc = acc_s[...]
        l = acc[:, mu_pad - 1:]                    # softmax denominator (TQ, 1)
        # exact reciprocal: runs once per query tile, not in the hot loop
        v = (acc * (1.0 / l)).astype(compute_dtype)                # (TQ, mu_pad)
        pre = jnp.dot(v, wpre_ref[...],
                      preferred_element_type=jnp.float32) + bpre_ref[...]
        x_q = x_q_ref[...].astype(jnp.float32)
        out = jnp.maximum((pre + x_q) * ps_ref[...] + psh_ref[...], 0.0)
        o_ref[...] = out.astype(o_ref.dtype)


# ------------------------------- wrapper -----------------------------------

def _pick_tile(hw, cap):
    """Multiple-of-8 tile, <= cap, balanced so the row padding of hw stays
    below one tile."""
    cap = max(8, int(cap))
    t = min(_round_up(cap, 8), _round_up(hw, 8))
    n = -(-hw // t)                       # number of tiles at the cap
    return _round_up(-(-hw // n), 8)      # equalize: smallest tile keeping n


def _footprint_bytes(tq, tk, C, f0_pad, mu_pad, in_isz, cd_isz, w_bytes):
    kv_w = f0_pad + mu_pad
    blocks = 2 * (tq * C * in_isz            # x_q (double-buffered)
                  + tk * kv_w * cd_isz       # kv  (double-buffered)
                  + tq * C * in_isz)         # out (double-buffered)
    scratch = tq * f0_pad * cd_isz + 4 * tq + 4 * tq * mu_pad
    temps = 2 * tq * tk * 4                  # (TQ, TK) s / p f32 temporaries
    return blocks + scratch + temps + 2 * w_bytes


def nonlocal_block_pallas(x_nchw, params, *, tq=None, tk=None):
    """Fused NonLocalBlock forward (NCHW in, NCHW out)."""
    B, C, H, W = x_nchw.shape
    HW = H * W
    f0_pad = params["f0_pad"]
    mu_pad = params["mu_pad"]
    kv_w = f0_pad + mu_pad
    cd = params["compute_dtype"]

    # NCHW -> (B, HW, C) channels-last.  Channels keep their true width C (the
    # projection weights carry the lane padding) to avoid the C_pad/C HBM
    # blow-up of padding x / the output when C << 128.
    x2d = jnp.transpose(x_nchw, (0, 2, 3, 1)).reshape(B, HW, C)

    weights = [params[k] for k in ("wt", "bt", "wpre", "bpre", "ps", "psh")]
    w_bytes = sum(int(w.size) * jnp.dtype(w.dtype).itemsize for w in weights)
    in_isz = jnp.dtype(x_nchw.dtype).itemsize
    cd_isz = jnp.dtype(cd).itemsize

    # Big query tiles cut key-side re-streaming / per-step overhead; keep key
    # tiles moderate since the (TQ,TK) temporaries scale with both.  Budgets
    # come from the actual per-step footprint, not physical VMEM.
    tq_ = _pick_tile(HW, 1024 if tq is None else tq)
    tk_ = _pick_tile(HW, 512 if tk is None else tk)
    budget = 24 << 20
    while True:
        fp = _footprint_bytes(tq_, tk_, C, f0_pad, mu_pad, in_isz, cd_isz, w_bytes)
        if fp <= budget or (tq_ <= 128 and tk_ <= 128):
            break
        if tq_ >= tk_:
            tq_ = max(128, _round_up(tq_ // 2, 8))
        else:
            tk_ = max(128, _round_up(tk_ // 2, 8))
    vmem_limit = int(min(56 << 20, max(32 << 20, 2 * fp)))

    n_q = -(-HW // tq_)
    n_k = -(-HW // tk_)
    hw_q = n_q * tq_
    hw_k = n_k * tk_

    # Key/value projection hoisted out of the attention grid: computed once per
    # batch element (vs. once per query tile inside the kernel) and streamed as
    # a lane-dense compute_dtype array (halves key-side HBM traffic on bf16).
    kv = jax.nn.relu(jnp.einsum("bnc,cf->bnf", x2d, params["wkv"])
                     + params["bkv"])
    # Row padding applied AFTER the projection: padded key rows are all-zero
    # (including the constant-1 row-sum column), so they drop out of the
    # online softmax exactly -- no in-kernel masking needed.
    kv = jnp.pad(kv, ((0, 0), (0, hw_k - HW), (0, 0))).astype(cd)
    x_q = jnp.pad(x2d, ((0, 0), (0, hw_q - HW), (0, 0)))

    kernel = functools.partial(_nonlocal_flash_kernel, f0_pad=f0_pad,
                               mu_pad=mu_pad, compute_dtype=cd)
    w_specs = [pl.BlockSpec(w.shape, lambda b, q, k: (0, 0)) for w in weights]

    # Advisory cost estimate (2 flops per MAC).
    flops = 2 * B * (hw_q * C * f0_pad                       # theta
                     + n_q * hw_k * tq_ * (f0_pad + mu_pad)  # scores + PV
                     + hw_q * mu_pad * C)                    # pre_head
    transcendentals = B * n_q * hw_k * tq_
    bytes_accessed = (int(x_q.size) * in_isz
                      + n_q * int(kv.size) * cd_isz
                      + B * hw_q * C * in_isz
                      + w_bytes)
    cost = pl.CostEstimate(flops=int(flops),
                           transcendentals=int(transcendentals),
                           bytes_accessed=int(bytes_accessed))

    out = pl.pallas_call(
        kernel,
        out_shape=jax.ShapeDtypeStruct((B, hw_q, C), x_nchw.dtype),
        grid_spec=pltpu.PrefetchScalarGridSpec(
            num_scalar_prefetch=0,
            grid=(B, n_q, n_k),
            in_specs=[
                pl.BlockSpec((None, tq_, C), lambda b, q, k: (b, q, 0)),
                pl.BlockSpec((None, tk_, kv_w), lambda b, q, k: (b, k, 0)),
            ] + w_specs,
            out_specs=pl.BlockSpec((None, tq_, C), lambda b, q, k: (b, q, 0)),
            scratch_shapes=[
                pltpu.VMEM((tq_, f0_pad), cd),           # resident theta tile
                pltpu.VMEM((tq_, 1), jnp.float32),       # running max m
                pltpu.VMEM((tq_, mu_pad), jnp.float32),  # f32 acc (+ row-sum col)
            ]),
        compiler_params=pltpu.CompilerParams(
            dimension_semantics=("parallel", "parallel", "arbitrary"),
            vmem_limit_bytes=vmem_limit),
        cost_estimate=cost,
    )(x_q, kv, *weights)

    out = out[:, :HW, :]                                 # drop query-row padding
    return jnp.transpose(out.reshape(B, H, W, C), (0, 3, 1, 2))


# ---------------- deterministic synthetic parameters ----------------

def _conv_params(key, cin, cout):
    kw, kb = jax.random.split(key)
    w = jax.random.normal(kw, (cout, cin), jnp.float32) / math.sqrt(cin)
    b = 0.1 * jax.random.normal(kb, (cout,), jnp.float32)
    return w, b


def _bn_params(key, c):
    k1, k2, k3, k4 = jax.random.split(key, 4)
    gamma = 1.0 + 0.1 * jax.random.normal(k1, (c,), jnp.float32)
    beta = 0.1 * jax.random.normal(k2, (c,), jnp.float32)
    mean = 0.1 * jax.random.normal(k3, (c,), jnp.float32)
    var = 0.5 + jnp.abs(jax.random.normal(k4, (c,), jnp.float32))
    return gamma, beta, mean, var


def make_raw_params(key, C, f0, f1):
    ks = jax.random.split(key, 8)
    return dict(
        theta=(_conv_params(ks[0], C, f0), _bn_params(ks[1], f0)),
        phi=(_conv_params(ks[2], C, f0), _bn_params(ks[3], f0)),
        mu=(_conv_params(ks[4], C, f1), _bn_params(ks[5], f1)),
        pre=_conv_params(ks[6], f1, C),   # pre_head: f1 -> C, w (C, f1), b (C,)
        post=_bn_params(ks[7], C),
    )


def _fold_conv_bn(w, b, gamma, beta, mean, var):
    # conv: y = x @ W^T + b ; BN(eval): (y - mean)*g/sqrt(v+eps) + beta
    scale = gamma / jnp.sqrt(var + _EPS)                  # (O,)
    w_f = w.T * scale[None, :]                            # (Cin, O)
    b_f = (b - mean) * scale + beta                       # (O,)
    return w_f, b_f


def fold_params(raw, compute_dtype=jnp.float32):
    """Fold eval-mode BN into the 1x1 convs, fuse phi|mu, pad to lane widths.

    The mu block is padded to at least f1+1 lanes; the last padded column gets
    zero weights and bias 1.0 so that after ReLU it is a constant-1 column
    whose attention accumulator doubles as the softmax row-sum (and masks
    zero-padded key rows exactly).  When f1 is already a lane multiple this
    costs one extra (mostly-zero) lane block on the PV matmul / kv stream.
    """
    (wt, bt), bnt = raw["theta"]
    (wp, bp), bnp_ = raw["phi"]
    (wm, bm), bnm = raw["mu"]
    wpre, bpre = raw["pre"]                               # (C, f1), (C,)
    gamma, beta, mean, var = raw["post"]

    f0, C = wt.shape
    f1 = wm.shape[0]
    f0_pad = _round_up(f0, _LANE)
    mu_pad = _round_up(f1 + 1, _LANE)                     # >= 1 spare column

    wt_f, bt_f = _fold_conv_bn(wt, bt, *bnt)
    wp_f, bp_f = _fold_conv_bn(wp, bp, *bnp_)
    wm_f, bm_f = _fold_conv_bn(wm, bm, *bnm)

    # theta projection: stays in-kernel (computed once per resident query tile)
    wt_p = _pad2(wt_f, C, f0_pad)                         # (C, f0_pad)
    bt_p = _pad1(bt_f, f0_pad)[None, :]

    # fused phi|mu projection: computed once per batch element in the wrapper;
    # zero-weight / bias=1 row-sum column in the mu padding.
    wkv = jnp.concatenate([_pad2(wp_f, C, f0_pad),
                           _pad2(wm_f, C, mu_pad)], axis=1)
    bkv = jnp.concatenate([_pad1(bp_f, f0_pad),
                           _pad1(bm_f, mu_pad).at[mu_pad - 1].set(1.0)])[None, :]

    # pre_head (f1 -> C); padded rows (incl. the row-sum column) are zero.
    wpre_p = _pad2(wpre.T, mu_pad, C)                     # (mu_pad, C)
    bpre_p = bpre[None, :]

    # post_head: eval-mode BN folded to a per-channel affine (ReLU in-kernel).
    scale = gamma / jnp.sqrt(var + _EPS)
    ps = scale[None, :]
    psh = (beta - mean * scale)[None, :]

    cd = compute_dtype
    return dict(
        wt=wt_p.astype(cd), bt=bt_p,
        wkv=wkv, bkv=bkv,
        wpre=wpre_p.astype(cd), bpre=bpre_p,
        ps=ps, psh=psh,
        C=C, f0=f0, f1=f1, f0_pad=f0_pad, mu_pad=mu_pad,
        compute_dtype=cd,
    )


# ---------------- pure-JAX reference (mirrors the PyTorch forward) ----------------

def reference_forward(x, raw):
    def conv1x1(t, w, b):
        return jnp.einsum('oc,bchw->bohw', w, t) + b[None, :, None, None]

    def bn_eval(t, gamma, beta, mean, var):
        inv = gamma / jnp.sqrt(var + _EPS)
        return (t - mean[None, :, None, None]) * inv[None, :, None, None] \
            + beta[None, :, None, None]

    (wt, bt), bnt = raw["theta"]
    (wp, bp), bnp_ = raw["phi"]
    (wm, bm), bnm = raw["mu"]
    wpre, bpre = raw["pre"]

    theta = jax.nn.relu(bn_eval(conv1x1(x, wt, bt), *bnt))
    phi = jax.nn.relu(bn_eval(conv1x1(x, wp, bp), *bnp_))
    mu = jax.nn.relu(bn_eval(conv1x1(x, wm, bm), *bnm))

    B, C, H, W = x.shape
    f0, f1 = theta.shape[1], mu.shape[1]
    outs = []
    for i in range(B):
        xi = theta[i].reshape(f0, -1).T                   # (HW, f0)
        yi = phi[i].reshape(f0, -1)                       # (f0, HW)
        zi = mu[i].reshape(f1, -1).T                      # (HW, f1)
        v = jax.nn.softmax(xi @ yi, axis=1)
        v = (v @ zi).reshape(H, W, f1)
        outs.append(jnp.transpose(v, (2, 0, 1))[None])    # put_channels_first
    u = jnp.concatenate(outs, 0)                          # (B, f1, H, W)
    pre = conv1x1(u, wpre, bpre)
    return jax.nn.relu(bn_eval(pre + x, *raw["post"]))


if __name__ == "__main__":
    B, C, H, W = 2, 4, 16, 16
    filters = (8, 8)

    key = jax.random.PRNGKey(0)
    kx, kp = jax.random.split(key)
    x = jax.random.normal(kx, (B, C, H, W), jnp.float32)

    raw = make_raw_params(kp, C, filters[0], filters[1])
    ref = reference_forward(x, raw)

    # --- f32 MXU-operand path, small tiles to exercise the online softmax ---
    params_f32 = fold_params(raw, compute_dtype=jnp.float32)
    out = jax.block_until_ready(nonlocal_block_pallas(x, params_f32, tq=128, tk=64))
    assert out.shape == (B, C, H, W)
    err = float(jnp.max(jnp.abs(out - ref)))
    assert jnp.allclose(out, ref, atol=1e-4, rtol=1e-4), f"f32 max abs err {err}"

    # --- bf16 MXU-operand fast path (f32 accumulation), default tile caps ---
    params_bf16 = fold_params(raw, compute_dtype=jnp.bfloat16)
    out_bf = jax.block_until_ready(nonlocal_block_pallas(x, params_bf16))
    err_bf = float(jnp.max(jnp.abs(out_bf - ref)))
    assert jnp.allclose(out_bf, ref, atol=1e-1, rtol=1e-1), \
        f"bf16 max abs err {err_bf}"

    # --- ragged HW: key rows zero-padded after the projection drop out of the
    # softmax exactly via the row-sum column (no masking needed) ---
    H2, W2 = 10, 15
    x2 = jax.random.normal(jax.random.PRNGKey(1), (B, C, H2, W2), jnp.float32)
    ref2 = reference_forward(x2, raw)
    out2 = jax.block_until_ready(nonlocal_block_pallas(x2, params_f32, tq=48, tk=64))
    err2 = float(jnp.max(jnp.abs(out2 - ref2)))
    assert jnp.allclose(out2, ref2, atol=1e-4, rtol=1e-4), \
        f"ragged max abs err {err2}"

    # --- f1 an exact lane multiple: row-sum column lives in an extra mu lane
    # block; verify that configuration too ---
    raw_b = make_raw_params(jax.random.PRNGKey(2), C, 8, 128)
    xb = jax.random.normal(jax.random.PRNGKey(3), (B, C, 8, 8), jnp.float32)
    ref_b = reference_forward(xb, raw_b)
    out_b = jax.block_until_ready(
        nonlocal_block_pallas(xb, fold_params(raw_b), tq=32, tk=32))
    err_b = float(jnp.max(jnp.abs(out_b - ref_b)))
    assert jnp.allclose(out_b, ref_b, atol=1e-4, rtol=1e-4), \
        f"f1=128 max abs err {err_b}"

    print("KERNEL_OK")
</pallas_src>

<mosaic_0001>
module attributes {stable_mosaic.version = 11 : i64} {
  func.func @_nonlocal_flash_kernel(%arg0: i32, %arg1: i32, %arg2: i32, %arg3: memref<1x128x4xf32, #tpu.memory_space<vmem>>, %arg4: memref<1x64x256xf32, #tpu.memory_space<vmem>>, %arg5: memref<4x128xf32, #tpu.memory_space<vmem>>, %arg6: memref<1x128xf32, #tpu.memory_space<vmem>>, %arg7: memref<128x4xf32, #tpu.memory_space<vmem>>, %arg8: memref<1x4xf32, #tpu.memory_space<vmem>>, %arg9: memref<1x4xf32, #tpu.memory_space<vmem>>, %arg10: memref<1x4xf32, #tpu.memory_space<vmem>>, %arg11: memref<1x128x4xf32, #tpu.memory_space<vmem>>, %arg12: memref<128x128xf32, #tpu.memory_space<vmem>>, %arg13: memref<128x1xf32, #tpu.memory_space<vmem>>, %arg14: memref<128x128xf32, #tpu.memory_space<vmem>>) attributes {dimension_semantics = [#tpu.dimension_semantics<parallel>, #tpu.dimension_semantics<parallel>, #tpu.dimension_semantics<arbitrary>], iteration_bounds = array<i64: 2, 2, 4>, scalar_prefetch = 0 : i64, scratch_operands = 3 : i64, tpu.core_type = #tpu.core_type<tc>, window_params = [{transform_indices = @transform_0, window_bounds = array<i64: 1, 128, 4>}, {transform_indices = @transform_1, window_bounds = array<i64: 1, 64, 256>}, {pipeline_mode = #tpu.pipeline_mode<synchronous>, transform_indices = @transform_2, window_bounds = array<i64: 4, 128>}, {pipeline_mode = #tpu.pipeline_mode<synchronous>, transform_indices = @transform_3, window_bounds = array<i64: 1, 128>}, {pipeline_mode = #tpu.pipeline_mode<synchronous>, transform_indices = @transform_4, window_bounds = array<i64: 128, 4>}, {pipeline_mode = #tpu.pipeline_mode<synchronous>, transform_indices = @transform_5, window_bounds = array<i64: 1, 4>}, {pipeline_mode = #tpu.pipeline_mode<synchronous>, transform_indices = @transform_6, window_bounds = array<i64: 1, 4>}, {pipeline_mode = #tpu.pipeline_mode<synchronous>, transform_indices = @transform_7, window_bounds = array<i64: 1, 4>}, {transform_indices = @transform_8, window_bounds = array<i64: 1, 128, 4>}]} {
    %c0_i32 = arith.constant 0 : i32
    %0 = arith.cmpi eq, %arg2, %c0_i32 : i32
    %1 = arith.extui %0 : i1 to i32
    %c0_i32_0 = arith.constant 0 : i32
    %2 = arith.cmpi ne, %1, %c0_i32_0 : i32
    scf.if %2 {
      %c0_16 = arith.constant 0 : index
      %c0_17 = arith.constant 0 : index
      %c0_18 = arith.constant 0 : index
      %28 = vector.load %arg3[%c0_16, %c0_17, %c0_18] : memref<1x128x4xf32, #tpu.memory_space<vmem>>, vector<1x128x4xf32>
      %29 = vector.shape_cast %28 : vector<1x128x4xf32> to vector<128x4xf32>
      %c0_19 = arith.constant 0 : index
      %c0_20 = arith.constant 0 : index
      %30 = vector.load %arg5[%c0_19, %c0_20] : memref<4x128xf32, #tpu.memory_space<vmem>>, vector<4x128xf32>
      %cst_21 = arith.constant dense<0.000000e+00> : vector<128x128xf32>
      %31 = tpu.matmul %29, %30, %cst_21 {dimension_numbers = #tpu.dot_dimension_numbers<[1], [0], [0], [1], [0, 0, 1, 1], [], []>} : vector<128x4xf32>, vector<4x128xf32>, vector<128x128xf32> -> vector<128x128xf32>
      %c0_22 = arith.constant 0 : index
      %c0_23 = arith.constant 0 : index
      %32 = vector.load %arg6[%c0_22, %c0_23] : memref<1x128xf32, #tpu.memory_space<vmem>>, vector<1x128xf32>
      %33 = vector.broadcast %32 : vector<1x128xf32> to vector<128x128xf32>
      %34 = arith.addf %31, %33 : vector<128x128xf32>
      %cst_24 = arith.constant 0.000000e+00 : f32
      %35 = vector.broadcast %cst_24 : f32 to vector<128x128xf32>
      %36 = arith.maximumf %34, %35 : vector<128x128xf32>
      %c0_25 = arith.constant 0 : index
      %c0_26 = arith.constant 0 : index
      %37 = vector.load %arg12[%c0_25, %c0_26] : memref<128x128xf32, #tpu.memory_space<vmem>>, vector<128x128xf32>
      tpu.vector_store %arg12[%c0_25, %c0_26], %36 {strides = array<i32>} : memref<128x128xf32, #tpu.memory_space<vmem>>, vector<128x128xf32>,
      %cst_27 = arith.constant 0xFF800000 : f32
      %38 = vector.broadcast %cst_27 : f32 to vector<128x1xf32>
      %c0_28 = arith.constant 0 : index
      %c0_29 = arith.constant 0 : index
      %39 = vector.load %arg13[%c0_28, %c0_29] : memref<128x1xf32, #tpu.memory_space<vmem>>, vector<128x1xf32>
      tpu.vector_store %arg13[%c0_28, %c0_29], %38 {strides = array<i32>} : memref<128x1xf32, #tpu.memory_space<vmem>>, vector<128x1xf32>,
      %cst_30 = arith.constant 0.000000e+00 : f32
      %40 = vector.broadcast %cst_30 : f32 to vector<128x128xf32>
      %c0_31 = arith.constant 0 : index
      %c0_32 = arith.constant 0 : index
      %41 = vector.load %arg14[%c0_31, %c0_32] : memref<128x128xf32, #tpu.memory_space<vmem>>, vector<128x128xf32>
      tpu.vector_store %arg14[%c0_31, %c0_32], %40 {strides = array<i32>} : memref<128x128xf32, #tpu.memory_space<vmem>>, vector<128x128xf32>,
    } else {
    }
    %c0 = arith.constant 0 : index
    %c0_1 = arith.constant 0 : index
    %c0_2 = arith.constant 0 : index
    %3 = vector.load %arg4[%c0, %c0_1, %c0_2] : memref<1x64x256xf32, #tpu.memory_space<vmem>>, vector<1x64x256xf32>
    %4 = vector.shape_cast %3 : vector<1x64x256xf32> to vector<64x256xf32>
    %5 = vector.extract_strided_slice %4 {offsets = [0, 0], sizes = [64, 128], strides = [1, 1]} : vector<64x256xf32> to vector<64x128xf32>
    %6 = vector.extract_strided_slice %4 {offsets = [0, 128], sizes = [64, 128], strides = [1, 1]} : vector<64x256xf32> to vector<64x128xf32>
    %c0_3 = arith.constant 0 : index
    %c0_4 = arith.constant 0 : index
    %7 = vector.load %arg12[%c0_3, %c0_4] : memref<128x128xf32, #tpu.memory_space<vmem>>, vector<128x128xf32>
    %cst = arith.constant dense<0.000000e+00> : vector<128x64xf32>
    %8 = tpu.matmul %7, %5, %cst {dimension_numbers = #tpu.dot_dimension_numbers<[1], [1], [0], [0], [0, 0, 1, 0], [], []>} : vector<128x128xf32>, vector<64x128xf32>, vector<128x64xf32> -> vector<128x64xf32>
    %c0_5 = arith.constant 0 : index
    %c0_6 = arith.constant 0 : index
    %9 = vector.load %arg13[%c0_5, %c0_6] : memref<128x1xf32, #tpu.memory_space<vmem>>, vector<128x1xf32>
    %cst_7 = arith.constant dense<0xFF800000> : vector<128xf32>
    %10 = vector.multi_reduction <maximumf>, %8, %cst_7 [1] : vector<128x64xf32> to vector<128xf32>
    %11 = vector.shape_cast %10 : vector<128xf32> to vector<128x1xf32>
    %12 = arith.maximumf %9, %11 : vector<128x1xf32>
    %13 = arith.subf %9, %12 : vector<128x1xf32>
    %14 = math.exp %13 : vector<128x1xf32>
    %15 = vector.broadcast %12 : vector<128x1xf32> to vector<128x64xf32>
    %16 = arith.subf %8, %15 : vector<128x64xf32>
    %17 = math.exp %16 : vector<128x64xf32>
    %c0_8 = arith.constant 0 : index
    %c0_9 = arith.constant 0 : index
    %18 = vector.load %arg14[%c0_8, %c0_9] : memref<128x128xf32, #tpu.memory_space<vmem>>, vector<128x128xf32>
    %19 = vector.broadcast %14 : vector<128x1xf32> to vector<128x128xf32>
    %20 = arith.mulf %19, %18 : vector<128x128xf32>
    %cst_10 = arith.constant dense<0.000000e+00> : vector<128x128xf32>
    %21 = tpu.matmul %17, %6, %cst_10 {dimension_numbers = #tpu.dot_dimension_numbers<[1], [0], [0], [1], [0, 0, 1, 1], [], []>} : vector<128x64xf32>, vector<64x128xf32>, vector<128x128xf32> -> vector<128x128xf32>
    %22 = arith.addf %20, %21 : vector<128x128xf32>
    %c0_11 = arith.constant 0 : index
    %c0_12 = arith.constant 0 : index
    %23 = vector.load %arg14[%c0_11, %c0_12] : memref<128x128xf32, #tpu.memory_space<vmem>>, vector<128x128xf32>
    tpu.vector_store %arg14[%c0_11, %c0_12], %22 {strides = array<i32>} : memref<128x128xf32, #tpu.memory_space<vmem>>, vector<128x128xf32>,
    %c0_13 = arith.constant 0 : index
    %c0_14 = arith.constant 0 : index
    %24 = vector.load %arg13[%c0_13, %c0_14] : memref<128x1xf32, #tpu.memory_space<vmem>>, vector<128x1xf32>
    tpu.vector_store %arg13[%c0_13, %c0_14], %12 {strides = array<i32>} : memref<128x1xf32, #tpu.memory_space<vmem>>, vector<128x1xf32>,
    %c3_i32 = arith.constant 3 : i32
    %25 = arith.cmpi eq, %arg2, %c3_i32 : i32
    %26 = arith.extui %25 : i1 to i32
    %c0_i32_15 = arith.constant 0 : i32
    %27 = arith.cmpi ne, %26, %c0_i32_15 : i32
    scf.if %27 {
      %c0_16 = arith.constant 0 : index
      %c0_17 = arith.constant 0 : index
      %28 = vector.load %arg14[%c0_16, %c0_17] : memref<128x128xf32, #tpu.memory_space<vmem>>, vector<128x128xf32>
      %29 = vector.extract_strided_slice %28 {offsets = [0, 127], sizes = [128, 1], strides = [1, 1]} : vector<128x128xf32> to vector<128x1xf32>
      %cst_18 = arith.constant 1.000000e+00 : f32
      %30 = vector.broadcast %cst_18 : f32 to vector<128x1xf32>
      %31 = arith.divf %30, %29 : vector<128x1xf32>
      %32 = vector.broadcast %31 : vector<128x1xf32> to vector<128x128xf32>
      %33 = arith.mulf %28, %32 : vector<128x128xf32>
      %c0_19 = arith.constant 0 : index
      %c0_20 = arith.constant 0 : index
      %34 = vector.load %arg7[%c0_19, %c0_20] : memref<128x4xf32, #tpu.memory_space<vmem>>, vector<128x4xf32>
      %cst_21 = arith.constant dense<0.000000e+00> : vector<128x4xf32>
      %35 = tpu.matmul %33, %34, %cst_21 {dimension_numbers = #tpu.dot_dimension_numbers<[1], [0], [0], [1], [0, 0, 1, 1], [], []>} : vector<128x128xf32>, vector<128x4xf32>, vector<128x4xf32> -> vector<128x4xf32>
      %c0_22 = arith.constant 0 : index
      %c0_23 = arith.constant 0 : index
      %36 = vector.load %arg8[%c0_22, %c0_23] : memref<1x4xf32, #tpu.memory_space<vmem>>, vector<1x4xf32>
      %37 = vector.broadcast %36 : vector<1x4xf32> to vector<128x4xf32>
      %38 = arith.addf %35, %37 : vector<128x4xf32>
      %c0_24 = arith.constant 0 : index
      %c0_25 = arith.constant 0 : index
      %c0_26 = arith.constant 0 : index
      %39 = vector.load %arg3[%c0_24, %c0_25, %c0_26] : memref<1x128x4xf32, #tpu.memory_space<vmem>>, vector<1x128x4xf32>
      %40 = vector.shape_cast %39 : vector<1x128x4xf32> to vector<128x4xf32>
      %41 = arith.addf %38, %40 : vector<128x4xf32>
      %c0_27 = arith.constant 0 : index
      %c0_28 = arith.constant 0 : index
      %42 = vector.load %arg9[%c0_27, %c0_28] : memref<1x4xf32, #tpu.memory_space<vmem>>, vector<1x4xf32>
      %43 = vector.broadcast %42 : vector<1x4xf32> to vector<128x4xf32>
      %44 = arith.mulf %41, %43 : vector<128x4xf32>
      %c0_29 = arith.constant 0 : index
      %c0_30 = arith.constant 0 : index
      %45 = vector.load %arg10[%c0_29, %c0_30] : memref<1x4xf32, #tpu.memory_space<vmem>>, vector<1x4xf32>
      %46 = vector.broadcast %45 : vector<1x4xf32> to vector<128x4xf32>
      %47 = arith.addf %44, %46 : vector<128x4xf32>
      %cst_31 = arith.constant 0.000000e+00 : f32
      %48 = vector.broadcast %cst_31 : f32 to vector<128x4xf32>
      %49 = arith.maximumf %47, %48 : vector<128x4xf32>
      %c0_32 = arith.constant 0 : index
      %c0_33 = arith.constant 0 : index
      %c0_34 = arith.constant 0 : index
      %50 = vector.load %arg11[%c0_32, %c0_33, %c0_34] : memref<1x128x4xf32, #tpu.memory_space<vmem>>, vector<1x128x4xf32>
      %51 = vector.shape_cast %50 : vector<1x128x4xf32> to vector<128x4xf32>
      %52 = vector.shape_cast %49 : vector<128x4xf32> to vector<1x128x4xf32>
      tpu.vector_store %arg11[%c0_32, %c0_33, %c0_34], %52 {strides = array<i32>} : memref<1x128x4xf32, #tpu.memory_space<vmem>>, vector<1x128x4xf32>,
    } else {
    }
    return
  }
  func.func @transform_0(%arg0: i32, %arg1: i32, %arg2: i32) -> (i32, i32, i32) {
    %c0_i32 = arith.constant 0 : i32
    %c0_i32_0 = arith.constant 0 : i32
    return %arg0, %arg1, %c0_i32 : i32, i32, i32
  }
  func.func @transform_1(%arg0: i32, %arg1: i32, %arg2: i32) -> (i32, i32, i32) {
    %c0_i32 = arith.constant 0 : i32
    %c0_i32_0 = arith.constant 0 : i32
    return %arg0, %arg2, %c0_i32 : i32, i32, i32
  }
  func.func @transform_2(%arg0: i32, %arg1: i32, %arg2: i32) -> (i32, i32) {
    %c0_i32 = arith.constant 0 : i32
    %c0_i32_0 = arith.constant 0 : i32
    %c0_i32_1 = arith.constant 0 : i32
    return %c0_i32, %c0_i32_0 : i32, i32
  }
  func.func @transform_3(%arg0: i32, %arg1: i32, %arg2: i32) -> (i32, i32) {
    %c0_i32 = arith.constant 0 : i32
    %c0_i32_0 = arith.constant 0 : i32
    %c0_i32_1 = arith.constant 0 : i32
    return %c0_i32, %c0_i32_0 : i32, i32
  }
  func.func @transform_4(%arg0: i32, %arg1: i32, %arg2: i32) -> (i32, i32) {
    %c0_i32 = arith.constant 0 : i32
    %c0_i32_0 = arith.constant 0 : i32
    %c0_i32_1 = arith.constant 0 : i32
    return %c0_i32, %c0_i32_0 : i32, i32
  }
  func.func @transform_5(%arg0: i32, %arg1: i32, %arg2: i32) -> (i32, i32) {
    %c0_i32 = arith.constant 0 : i32
    %c0_i32_0 = arith.constant 0 : i32
    %c0_i32_1 = arith.constant 0 : i32
    return %c0_i32, %c0_i32_0 : i32, i32
  }
  func.func @transform_6(%arg0: i32, %arg1: i32, %arg2: i32) -> (i32, i32) {
    %c0_i32 = arith.constant 0 : i32
    %c0_i32_0 = arith.constant 0 : i32
    %c0_i32_1 = arith.constant 0 : i32
    return %c0_i32, %c0_i32_0 : i32, i32
  }
  func.func @transform_7(%arg0: i32, %arg1: i32, %arg2: i32) -> (i32, i32) {
    %c0_i32 = arith.constant 0 : i32
    %c0_i32_0 = arith.constant 0 : i32
    %c0_i32_1 = arith.constant 0 : i32
    return %c0_i32, %c0_i32_0 : i32, i32
  }
  func.func @transform_8(%arg0: i32, %arg1: i32, %arg2: i32) -> (i32, i32, i32) {
    %c0_i32 = arith.constant 0 : i32
    %c0_i32_0 = arith.constant 0 : i32
    return %arg0, %arg1, %c0_i32 : i32, i32, i32
  }
}

</mosaic_0001>

<bundles_post_ra>
// kernel: tpu_custom_call.1
= control target key start
LH: loop header
LB: loop body
LE: loop exit
PB: predicated region body
PF: predicated region fallthrough
CT: control target
= control target key end

     0   :  { %s3384_s0 = inlined_call_operand.vmem [shape: f32[2,256,4], index: 0, kind: input, shape index: {}]   ;;  %s3385_s1 = inlined_call_operand.hbm [shape: f32[2,256,256], index: 1, kind: input, shape index: {}]   ;;  %s3386_s2 = inlined_call_operand.vmem [shape: f32[4,128], index: 2, kind: input, shape index: {}]   ;;  %s3387_s3 = inlined_call_operand.vmem [shape: f32[1,128], index: 3, kind: input, shape index: {}]   ;;  %s3388_s4 = inlined_call_operand.vmem [shape: f32[128,4], index: 4, kind: input, shape index: {}]   ;;  %s3389_s5 = inlined_call_operand.vmem [shape: f32[1,4], index: 5, kind: input, shape index: {}]   ;;  %s3390_s6 = inlined_call_operand.vmem [shape: f32[1,4], index: 6, kind: input, shape index: {}]   ;;  %s3391_s7 = inlined_call_operand.vmem [shape: f32[1,4], index: 7, kind: input, shape index: {}]   ;;  %s3392_s8 = inlined_call_operand.vmem [shape: f32[2,256,4], index: 8, kind: output, shape index: {}]  }
   0x1   :  { %3396 = sst [smem:[#allocation11_spill]] %s3386_s2 }
   0x2   :  { %3397 = sst [smem:[#allocation12_spill]] %s3387_s3 }
   0x3   :  { %3398 = sst [smem:[#allocation13_spill]] %s3388_s4 }
   0x4   :  { %3399 = sst [smem:[#allocation14_spill]] %s3389_s5 }
   0x5   :  { %3400 = sst [smem:[#allocation15_spill]] %s3390_s6 }
   0x6   :  { %3401 = sst [smem:[#allocation16_spill]] %s3391_s7 }
   0x7   :  { %13 = vsyncpa [#allocation6], 0 }
   0x8   :  { %15 = vsyncpa [#allocation6 + $0x1], 0  ;;  %s2735_s27 = smov 0   ;;  %s2737_s28 = smov 0  }
   0x9   :  { %s2739_s29 = smov 0   ;;  %s2741_s30 = smov 0  }
   0xa   :  { %s2743_s9 = smov 0   ;;  %s2745_s10 = smov 0  }
   0xb   :  { %s2747_s11 = smov 0   ;;  %s2749_s12 = smov 0  }
   0xc   :  { %s2751_s13 = smov 0   ;;  %s2753_s14 = smov 0  }
   0xd LB: > { %3402 = sst [smem:[#allocation8_spill]] %s2673_s12  ;;  %s2026_s15 = sadd.s32 4294967295, %s2681_s14   ;;  %s2681_s14 = sphi %s2753_s14, %s21_s14   ;;  %s2677_s13 = sphi %s2751_s13, %s3423_s13   ;;  %s2673_s12 = sphi %s2749_s12, %s3416_s12   ;;  %s2669_s11 = sphi %s2747_s11, %s3422_s11   ;;  %s2665_s10 = sphi %s2745_s10, %s3421_s10   ;;  %s2661_s9 = sphi %s2743_s9, %s3414_s9   ;;  %s2657_s30 = sphi %s2741_s30, %s3420_s30   ;;  %s2653_s29 = sphi %s2739_s29, %s3419_s29   ;;  %s2649_s28 = sphi %s2737_s28, %s3418_s28   ;;  %s2645_s27 = sphi %s2735_s27, %s3417_s27  }
   0xe   : > { %s33_s16 = sadd.s32 1, %s2669_s11  ;;  %s36_s17 = sadd.s32 1, %s2673_s12 }
   0xf   : > { %p34_p0 = scmp.ge.s32.totalorder %s33_s16, 4  ;;  %s40_s18 = sadd.s32 1, %s2677_s13 }
  0x10   : > { %s77_s19 = sadd.s32 1, %s2653_s29  ;;  %p84_p1 = scmp.ne.s32.totalorder %s2653_s29, %s2649_s28 }
  0x11   : > { %s3425_s16 = smov (%p34_p0, %s33_s16), 0  ;;  %s3427_s17 = smov (!%p34_p0, %s36_s17), %s2673_s12 }
  0x12   : > { %3403 = sst [smem:[#allocation9_spill]] %s3425_s16  ;;  %s73_s20 = ssub.s32 %s2669_s11, %s3425_s16 }
  0x13   : > { %p38_p2 = scmp.ge.s32.totalorder %s3427_s17, 2  ;;  %p85_p3 = scmp.eq.s32.totalorder %s2681_s14, 0 }
  0x14   : > { %p90_p4 = scmp.ne.s32.totalorder %s2649_s28, %s2645_s27  ;;  %p91_p5 = scmp.eq.s32.totalorder %s2026_s15, 0 }
  0x15   : > { %s3429_s17 = smov (%p38_p2, %s3427_s17), 0  ;;  %s3431_s18 = smov (!%p38_p2, %s40_s18), %s2677_s13 }
  0x16   : > { %3404 = sst [smem:[#allocation10_spill]] %s3429_s17  ;;  %p2800_p6 = por %p85_p3, %p84_p1 }
  0x17   : > { %p2804_p7 = por %p91_p5, %p90_p4  ;;  %p42_p8 = scmp.ge.s32.totalorder %s3431_s18, 2 }
  0x18   : > { %p2384_p9 = scmp.lt.s32.totalorder %s2681_s14, 16  ;;  %s299_s23 = sand.u32 1, %s2653_s29  }
  0x19   : > { %s3433_s18 = smov (%p42_p8, %s3431_s18), 0  ;;  %s2030_s24 = sshll.u32 %s299_s23, 7 }
  0x1a   : > { %s72_s25 = ssub.s32 %s2677_s13, %s3433_s18  ;;  %s2084_s27 = sshll.u32 %s2669_s11, 4 }
  0x1b   : > { %s74_s26 = sor.u32 %s73_s20, %s72_s25  ;;  %s2033_s15 = sshll.u32 %s2677_s13, 6 }
  0x1c   : > { %p75_p10 = scmp.eq.s32.totalorder %s74_s26, 0  ;;  %s310_s17 = sadd.s32 %s2084_s27, %s2033_s15 }
  0x1d   : > { %s303_s16 = scalar_lea.vmem [#allocation5], %s2030_s24  ;;  %s2034_s6 = sshll.u32 %s310_s17, 7 }
  0x1e   : > { %s313_s12 = sshll.u32 %s303_s16, 4  ;;  %s312_s3 = scalar_lea.hbm %s3385_s1, %s2034_s6  ;;  %s314_s12 = int_to_ptr.vmem [resolvable:$true] %s313_s12 }
  0x1f   : > { %s2817_s7 = scalar_select %p75_p10, %s2653_s29, %s77_s19  }
  0x20   : > { %p2826_p11 = pnand %p2384_p9, %p2800_p6  ;;  %p2035_p12 = scmp.ge.s32.totalorder %s2681_s14, 1 }
  0x21   : > { %s300_s20 = scalar_lea.sflag [#allocation6], %s299_s23  ;;  %s2584_s16 = scalar_lea.vmem %s314_s12, 2048 }
  0x22   : > { %p2573_p13 = pneg %p2826_p11  ;;  %p2585_p0 = scmp.ne.s32.totalorder %s314_s12, %s2584_s16 }
  0x23   : > { %s2683_s17 = smov [#allocation5]  }
  0x24   : > { %p2587_p1 = pnand %p2585_p0, %p2573_p13  ;;  %s2589_s19 = sshll.u32 %s2683_s17, 4  ;;  %s2590_s19 = int_to_ptr.vmem [resolvable:$false] %s2589_s19 }
  0x25   : > { %s2591_s4 = scalar_lea.vmem %s2590_s19, 4096  ;;  %p2592_p3 = scmp.lt.s32.totalorder %s314_s12, %s2590_s19 }
  0x26   : > { %p2588_p2 = pneg %p2587_p1  ;;  %p2593_p4 = scmp.lt.s32.totalorder %s2591_s4, %s2584_s16 }
  0x28   : > { %p2594_p5 = por %p2593_p4, %p2592_p3 }
  0x2a   : > { %p2595_p6 = pnand %p2594_p5, %p2588_p2 }
  0x2c   : > { %2598 = shalt.err (!%p2595_p6)
}
  0x2d   : > { %s2684_s5 = smov 256   ;;  %s2685_s6 = smov 16  }
  0x2e   : > { %2383 = dma.hbm_to_vmem [thread:$0]  (!%p2826_p11), %s312_s3, 2048, %s314_s12, %s300_s20, %s2684_s5, %s2684_s5, %s2685_s6  }
  0x2f   : > { %p321_p8 = scmp.lt.s32.totalorder %s2681_s14, 17 }
  0x31   : > { %p322_p9 = pnand %p2035_p12, %p321_p8 }
  0x32   : > { %s327_s21 = sand.u32 (!%p322_p9), 1, %s2649_s28  }
  0x33   : > { %325 = sbr.rel (%p322_p9) target bundleno = 1412 (0x584), region = 52  ;;  %s2036_s23 = sshll.u32 (!%p322_p9), %s327_s21, 7 }
  0x34   : > { %s328_s24 = scalar_lea.sflag (!%p322_p9), [#allocation6], %s327_s21  ;;  %s2839_s25 = scalar_lea.vmem (!%p322_p9), [#allocation5], %s2036_s23 }
  0x38   : > { %2640 = dma.done.wait (%p2804_p7), %s328_s24, 2048  }
  0x39   : > { %2642 = vsyncadd (%p2804_p7), %s328_s24, 4294965248  ;;  %s2037_s2 = sshll.u32 %s2661_s9, 4  ;;  %p378_p10 = scmp.lt.s32.totalorder %s2665_s10, 1 }
  0x3a   : > { %p380_p11 = scmp.lt.s32.totalorder %s2037_s2, 31  ;;  %p2043_p7 = scmp.ne.s32.totalorder %s2657_s30, 0 }
  0x3b   : > { %s3435_s10 = smov (!%p378_p10, %s2665_s10), 1  ;;  %s3408_s4 = sld [smem:[#allocation11_spill]] (!%p2043_p7) }
  0x3c   : > { %s3437_s2 = smov (!%p380_p11, %s2037_s2), 31  ;;  %s2038_s3 = sshll.u32 %s3435_s10, 5 }
  0x3d   : > { %s383_s12 = sadd.s32 %s2038_s3, %s3437_s2  ;;  %401 = sbr.rel (%p2043_p7) target bundleno = 282 (0x11a), region = 60 }
  0x3e   : > { %s2039_s26 = sshll.u32 %s383_s12, 3  ;;  %s3409_s6 = sld [smem:[#allocation12_spill]] (!%p2043_p7) }
  0x3f   : > { %s2851_s20 = scalar_lea.vmem %s3384_s0, %s2039_s26  ;;  %s2856_s22 = scalar_lea.vmem %s3392_s8, %s2039_s26 }
  0x42   : > { %v418_v0 = vld [vmem:[%s3408_s4] sm:$0xf]  ;;  %vm475_vm0 = vcmask 1043456   ;;  %vm426_vm1 = vcmask 31744   ;;  %v403_v3 = vld [vmem:[%s2851_s20 + $0x8] sm:$0xff]  ;;  %v404_v5 = vld [vmem:[%s2851_s20 + $0x10] sm:$0xff] }
  0x43   : > { %v402_v1 = vld [vmem:[%s2851_s20] sm:$0xff]  ;;  %2182 = vmatprep.subr.msk.mxu0 %vm475_vm0, %v418_v0  ;;  %2344 = vmatprep.subr.msk.mxu1 %vm475_vm0, %v418_v0  ;;  %v411_v4 = vld [vmem:[%s2851_s20 + $0x48] sm:$0xff]  ;;  %v412_v6 = vld [vmem:[%s2851_s20 + $0x50] sm:$0xff]  ;;  %vm656_vm2 = vcmask 7168   ;;  %v2686_v17 = vmov -inf   ;;  %v2687_v18 = vmov 0.0  }
  0x44   : > { %v410_v2 = vld [vmem:[%s2851_s20 + $0x40] sm:$0xff]  ;;  %2183 = vmatpush3.msk.msra.mxu0 %vm475_vm0, %v418_v0  ;;  %2345 = vmatpush3.msk.msra.mxu1 %vm475_vm0, %v418_v0  ;;  %v405_v7 = vld [vmem:[%s2851_s20 + $0x18] sm:$0xff]  ;;  %v407_v11 = vld [vmem:[%s2851_s20 + $0x28] sm:$0xff]  ;;  %657 = vst.msk [vmem:[#allocation3] sm:$0xff] %vm656_vm2, %v2686_v17 }
  0x45   : > { %2184 = vmatprep.mubr.msk.f32.mxu0 %vm426_vm1, %v402_v1  ;;  %2196 = vmatprep.mubr.msk.f32.mxu1 %vm426_vm1, %v410_v2  ;;  %v413_v8 = vld [vmem:[%s2851_s20 + $0x58] sm:$0xff]  ;;  %v406_v9 = vld [vmem:[%s2851_s20 + $0x20] sm:$0xff]  ;;  %v415_v12 = vld [vmem:[%s2851_s20 + $0x68] sm:$0xff]  ;;  %658 = vst.msk [vmem:[#allocation3 + $0x8] sm:$0xff] %vm656_vm2, %v2686_v17 }
  0x46   : > { %2185 = vmatmul.mubr.msk.f32.vlgmr.msra.gmra.mxu0 %vm426_vm1, %v403_v3  ;;  %2197 = vmatmul.mubr.msk.f32.vlgmr.msra.gmra.mxu1 %vm426_vm1, %v411_v4  ;;  %v414_v10 = vld [vmem:[%s2851_s20 + $0x60] sm:$0xff]  ;;  %v408_v13 = vld [vmem:[%s2851_s20 + $0x30] sm:$0xff]  ;;  %v409_v15 = vld [vmem:[%s2851_s20 + $0x38] sm:$0xff]  ;;  %659 = vst.msk [vmem:[#allocation3 + $0x10] sm:$0xff] %vm656_vm2, %v2686_v17 }
  0x47   : > { %2187 = vmatprep.mubr.msk.f32.mxu0 %vm426_vm1, %v404_v5  ;;  %2199 = vmatprep.mubr.msk.f32.mxu1 %vm426_vm1, %v412_v6  ;;  %v416_v14 = vld [vmem:[%s2851_s20 + $0x70] sm:$0xff]  ;;  %v417_v16 = vld [vmem:[%s2851_s20 + $0x78] sm:$0xff]  ;;  %660 = vst.msk [vmem:[#allocation3 + $0x18] sm:$0xff] %vm656_vm2, %v2686_v17  ;;  %661 = vst.msk [vmem:[#allocation3 + $0x20] sm:$0xff] %vm656_vm2, %v2686_v17 }
  0x48   : > { %662 = vst.msk [vmem:[#allocation3 + $0x28] sm:$0xff] %vm656_vm2, %v2686_v17  ;;  %663 = vst.msk [vmem:[#allocation3 + $0x30] sm:$0xff] %vm656_vm2, %v2686_v17  ;;  %v2044_v19 = vld [vmem:[%s3409_s6] ss:$0 sm:$0xff] }
  0x49   : > { %664 = vst.msk [vmem:[#allocation3 + $0x38] sm:$0xff] %vm656_vm2, %v2686_v17  ;;  %665 = vst.msk [vmem:[#allocation3 + $0x40] sm:$0xff] %vm656_vm2, %v2686_v17 }
  0x4a   : > { %2188 = vmatmul.mubr.msk.f32.gmra.mxu0 %vm426_vm1, %v405_v7  ;;  %2200 = vmatmul.mubr.msk.f32.gmra.mxu1 %vm426_vm1, %v413_v8  ;;  %666 = vst.msk [vmem:[#allocation3 + $0x48] sm:$0xff] %vm656_vm2, %v2686_v17  ;;  %667 = vst.msk [vmem:[#allocation3 + $0x50] sm:$0xff] %vm656_vm2, %v2686_v17 }
  0x4b   : > { %2190 = vmatprep.mubr.msk.f32.mxu0 %vm426_vm1, %v406_v9  ;;  %2202 = vmatprep.mubr.msk.f32.mxu1 %vm426_vm1, %v414_v10  ;;  %668 = vst.msk [vmem:[#allocation3 + $0x58] sm:$0xff] %vm656_vm2, %v2686_v17  ;;  %669 = vst.msk [vmem:[#allocation3 + $0x60] sm:$0xff] %vm656_vm2, %v2686_v17 }
  0x4c   : > { %670 = vst.msk [vmem:[#allocation3 + $0x68] sm:$0xff] %vm656_vm2, %v2686_v17  ;;  %671 = vst.msk [vmem:[#allocation3 + $0x70] sm:$0xff] %vm656_vm2, %v2686_v17 }
  0x4d   : > { %672 = vst.msk [vmem:[#allocation3 + $0x78] sm:$0xff] %vm656_vm2, %v2686_v17  ;;  %673 = vst [vmem:[#allocation4 + $0x28] sm:$0xff] %v2687_v18 }
  0x4e   : > { %2191 = vmatmul.mubr.msk.f32.gmra.mxu0 %vm426_vm1, %v407_v11  ;;  %2203 = vmatmul.mubr.msk.f32.gmra.mxu1 %vm426_vm1, %v415_v12  ;;  %674 = vst [vmem:[#allocation4 + $0x68] sm:$0xff] %v2687_v18  ;;  %675 = vst [vmem:[#allocation4 + $0x10] sm:$0xff] %v2687_v18 }
  0x4f   : > { %2193 = vmatprep.mubr.msk.f32.mxu0 %vm426_vm1, %v408_v13  ;;  %2205 = vmatprep.mubr.msk.f32.mxu1 %vm426_vm1, %v416_v14  ;;  %676 = vst [vmem:[#allocation4 + $0x40] sm:$0xff] %v2687_v18  ;;  %677 = vst [vmem:[#allocation4 + $0x48] sm:$0xff] %v2687_v18 }
  0x50   : > { %678 = vst [vmem:[#allocation4 + $0x30] sm:$0xff] %v2687_v18  ;;  %679 = vst [vmem:[#allocation4 + $0x70] sm:$0xff] %v2687_v18 }
  0x51   : > { %680 = vst [vmem:[#allocation4 + $0x38] sm:$0xff] %v2687_v18  ;;  %681 = vst [vmem:[#allocation4 + $0x20] sm:$0xff] %v2687_v18 }
  0x52   : > { %2194 = vmatmul.mubr.msk.f32.gmra.mxu0 %vm426_vm1, %v409_v15  ;;  %2206 = vmatmul.mubr.msk.f32.gmra.mxu1 %vm426_vm1, %v417_v16  ;;  %682 = vst [vmem:[#allocation4 + $0x78] sm:$0xff] %v2687_v18  ;;  %683 = vst [vmem:[#allocation4 + $0x18] sm:$0xff] %v2687_v18 }
  0x53   : > { %684 = vst [vmem:[#allocation4 + $0x58] sm:$0xff] %v2687_v18  ;;  %685 = vst [vmem:[#allocation4] sm:$0xff] %v2687_v18 }
  0x54   : > { %686 = vst [vmem:[#allocation4 + $0x8] sm:$0xff] %v2687_v18  ;;  %687 = vst [vmem:[#allocation4 + $0x60] sm:$0xff] %v2687_v18 }
  0x55   : > { %688 = vst [vmem:[#allocation4 + $0x50] sm:$0xff] %v2687_v18 }
 0x106   : > { %v2186_v20 = vpop.f32.mrf.mxu0  ;;  %v2198_v21 = vpop.f32.mrf.mxu1 }
 0x107   : > { %v551_v22 = vadd.f32 %v2186_v20, %v2044_v19  ;;  %v591_v23 = vadd.f32 %v2198_v21, %v2044_v19 }
 0x108   : > { %v545_v24 = vpop.f32.mrf.mxu0  ;;  %v585_v25 = vpop.f32.mrf.mxu1 }
 0x109   : > { %v625_v26 = vmax.f32 %v551_v22, 0.0  ;;  %v633_v27 = vmax.f32 %v591_v23, 0.0  ;;  %v546_v28 = vadd.f32 %v2044_v19, %v545_v24  ;;  %v586_v29 = vadd.f32 %v2044_v19, %v585_v25 }
 0x10a   : > { %v2189_v30 = vpop.f32.mrf.mxu0  ;;  %v2201_v31 = vpop.f32.mrf.mxu1 }
 0x10b   : > { %641 = vst [vmem:[#allocation2] sm:$0xff] %v625_v26  ;;  %649 = vst [vmem:[#allocation2 + $0x20] sm:$0xff] %v633_v27  ;;  %v624_v32 = vmax.f32 %v546_v28, 0.0  ;;  %v632_v33 = vmax.f32 %v586_v29, 0.0  ;;  %v561_v34 = vadd.f32 %v2189_v30, %v2044_v19  ;;  %v601_v35 = vadd.f32 %v2201_v31, %v2044_v19 }
 0x10c   : > { %v555_v36 = vpop.f32.mrf.mxu0  ;;  %v595_v37 = vpop.f32.mrf.mxu1 }
 0x10d   : > { %640 = vst [vmem:[#allocation2 + $0x30] sm:$0xff] %v624_v32  ;;  %648 = vst [vmem:[#allocation2 + $0x40] sm:$0xff] %v632_v33  ;;  %v627_v38 = vmax.f32 %v561_v34, 0.0  ;;  %v635_v39 = vmax.f32 %v601_v35, 0.0  ;;  %v556_v40 = vadd.f32 %v2044_v19, %v555_v36  ;;  %v596_v41 = vadd.f32 %v2044_v19, %v595_v37 }
 0x10e   : > { %v2192_v42 = vpop.f32.mrf.mxu0  ;;  %v2204_v43 = vpop.f32.mrf.mxu1 }
 0x10f   : > { %643 = vst [vmem:[#allocation2 + $0x18] sm:$0xff] %v627_v38  ;;  %651 = vst [vmem:[#allocation2 + $0x38] sm:$0xff] %v635_v39  ;;  %v626_v44 = vmax.f32 %v556_v40, 0.0  ;;  %v634_v45 = vmax.f32 %v596_v41, 0.0  ;;  %v571_v46 = vadd.f32 %v2192_v42, %v2044_v19  ;;  %v611_v47 = vadd.f32 %v2204_v43, %v2044_v19 }
 0x110   : > { %v565_v48 = vpop.f32.mrf.mxu0  ;;  %v605_v49 = vpop.f32.mrf.mxu1 }
 0x111   : > { %642 = vst [vmem:[#allocation2 + $0x58] sm:$0xff] %v626_v44  ;;  %650 = vst [vmem:[#allocation2 + $0x10] sm:$0xff] %v634_v45  ;;  %v629_v50 = vmax.f32 %v571_v46, 0.0  ;;  %v637_v51 = vmax.f32 %v611_v47, 0.0  ;;  %v566_v52 = vadd.f32 %v2044_v19, %v565_v48  ;;  %v606_v53 = vadd.f32 %v2044_v19, %v605_v49 }
 0x112   : > { %v2195_v54 = vpop.f32.mrf.mxu0  ;;  %v2207_v55 = vpop.f32.mrf.mxu1 }
 0x113   : > { %645 = vst [vmem:[#allocation2 + $0x68] sm:$0xff] %v629_v50  ;;  %653 = vst [vmem:[#allocation2 + $0x70] sm:$0xff] %v637_v51  ;;  %v628_v56 = vmax.f32 %v566_v52, 0.0  ;;  %v636_v57 = vmax.f32 %v606_v53, 0.0  ;;  %v581_v58 = vadd.f32 %v2195_v54, %v2044_v19  ;;  %v621_v59 = vadd.f32 %v2207_v55, %v2044_v19 }
 0x114   : > { %v575_v60 = vpop.f32.mrf.mxu0  ;;  %v615_v61 = vpop.f32.mrf.mxu1 }
 0x115   : > { %644 = vst [vmem:[#allocation2 + $0x50] sm:$0xff] %v628_v56  ;;  %652 = vst [vmem:[#allocation2 + $0x60] sm:$0xff] %v636_v57  ;;  %v631_v62 = vmax.f32 %v581_v58, 0.0  ;;  %v639_v63 = vmax.f32 %v621_v59, 0.0  ;;  %v576_v0 = vadd.f32 %v2044_v19, %v575_v60  ;;  %v616_v1 = vadd.f32 %v2044_v19, %v615_v61 }
 0x117   : > { %647 = vst [vmem:[#allocation2 + $0x48] sm:$0xff] %v631_v62  ;;  %655 = vst [vmem:[#allocation2 + $0x28] sm:$0xff] %v639_v63  ;;  %v630_v2 = vmax.f32 %v576_v0, 0.0  ;;  %v638_v3 = vmax.f32 %v616_v1, 0.0 }
 0x119   : > { %646 = vst [vmem:[#allocation2 + $0x8] sm:$0xff] %v630_v2  ;;  %654 = vst [vmem:[#allocation2 + $0x78] sm:$0xff] %v638_v3 }
 0x11a PF: > { %v703_v4 = vld [vmem:[%s2839_s25 + $0x70] sm:$0xff]  ;;  %v701_v5 = vld [vmem:[%s2839_s25 + $0x60] sm:$0xff]  ;;  %v707_v14 = vld [vmem:[#allocation2 + $0x58] sm:$0xff]  ;;  %vm882_vm3 = vcmask 523264   ;;  %v2688_v44 = vmov 0   ;;  %vm1460_vm4 = vcmask 7168  }
 0x11b   : > { %2208 = vmatprep.subr.mxu0 %v703_v4  ;;  %v705_v6 = vld [vmem:[#allocation2 + $0x30] sm:$0xff]  ;;  %v697_v8 = vld [vmem:[%s2839_s25 + $0x40] sm:$0xff]  ;;  %v708_v15 = vld [vmem:[#allocation2 + $0x18] sm:$0xff]  ;;  %2471 = vset.pattern.permute.xlu0 %v2688_v44  ;;  %p2078_p12 = scmp.ne.s32.totalorder %s2657_s30, 3 }
 0x11c   : > { %2209 = vmatpush3.xpose.msra.mxu0 %v703_v4  ;;  %2224 = vmatprep.mubr.f32.mxu0 %v705_v6  ;;  %v699_v7 = vld [vmem:[%s2839_s25 + $0x50] sm:$0xff]  ;;  %v693_v10 = vld [vmem:[%s2839_s25 + $0x20] sm:$0xff]  ;;  %v710_v17 = vld [vmem:[#allocation2 + $0x68] sm:$0xff]  ;;  %s3410_s23 = sld [smem:[#allocation13_spill]] (!%p2078_p12) }
 0x11d   : > { %2210 = vmatprep.subr.mxu0 %v701_v5  ;;  %v695_v9 = vld [vmem:[%s2839_s25 + $0x30] sm:$0xff]  ;;  %v689_v12 = vld [vmem:[%s2839_s25] sm:$0xff]  ;;  %v716_v23 = vld [vmem:[#allocation2 + $0x38] sm:$0xff]  ;;  %2472 = vset.pattern.permute.xlu1 %v2688_v44  ;;  %s3411_s5 = sld [smem:[#allocation14_spill]] (!%p2078_p12) }
 0x11e   : > { %v691_v11 = vld [vmem:[%s2839_s25 + $0x10] sm:$0xff]  ;;  %v706_v13 = vld [vmem:[#allocation2] sm:$0xff]  ;;  %v712_v19 = vld [vmem:[#allocation2 + $0x48] sm:$0xff]  ;;  %s3412_s21 = sld [smem:[#allocation15_spill]] (!%p2078_p12) }
 0x11f   : > { %v709_v16 = vld [vmem:[#allocation2 + $0x50] sm:$0xff]  ;;  %v713_v20 = vld [vmem:[#allocation2 + $0x40] sm:$0xff]  ;;  %v720_v27 = vld [vmem:[#allocation2 + $0x28] sm:$0xff]  ;;  %s3413_s2 = sld [smem:[#allocation16_spill]] (!%p2078_p12) }
 0x120   : > { %2211 = vmatpush3.xpose.msra.mxu0 %v701_v5  ;;  %v711_v18 = vld [vmem:[#allocation2 + $0x8] sm:$0xff]  ;;  %v714_v21 = vld [vmem:[#allocation2 + $0x20] sm:$0xff]  ;;  %v715_v22 = vld [vmem:[#allocation2 + $0x10] sm:$0xff] }
 0x121   : > { %2212 = vmatprep.subr.mxu0 %v699_v7  ;;  %v717_v24 = vld [vmem:[#allocation2 + $0x60] sm:$0xff]  ;;  %v718_v25 = vld [vmem:[#allocation2 + $0x70] sm:$0xff]  ;;  %v719_v26 = vld [vmem:[#allocation2 + $0x78] sm:$0xff] }
 0x122   : > { %v2985_v61 = vld [vmem:[#allocation3] sm:$0xff]  ;;  %v2987_v63 = vld [vmem:[#allocation3 + $0x18] sm:$0xff]  ;;  %v867_v2 = vld [vmem:[#allocation3 + $0x8] sm:$0xff] }
 0x123   : > { %v2998_v5 = vld [vmem:[#allocation3 + $0x10] sm:$0xff]  ;;  %v704_v6 = vld [vmem:[%s2839_s25 + $0x78] sm:$0xff] }
 0x124   : > { %2213 = vmatpush3.xpose.msra.mxu0 %v699_v7  ;;  %2248 = vmatprep.subr.mxu1 %v704_v6 }
 0x125   : > { %2214 = vmatprep.subr.mxu0 %v697_v8  ;;  %2249 = vmatpush3.msra.mxu1 %v704_v6  ;;  %v3065_v6 = vld [vmem:[#allocation3 + $0x70] sm:$0xff] }
 0x128   : > { %2215 = vmatpush3.xpose.msra.mxu0 %v697_v8 }
 0x129   : > { %2216 = vmatprep.subr.mxu0 %v695_v9 }
 0x12c   : > { %2217 = vmatpush3.xpose.msra.mxu0 %v695_v9  ;;  %v3003_v9 = vld [vmem:[#allocation3 + $0x20] sm:$0xff] }
 0x12d   : > { %2218 = vmatprep.subr.mxu0 %v693_v10 }
 0x130   : > { %2219 = vmatpush3.xpose.msra.mxu0 %v693_v10  ;;  %v702_v10 = vld [vmem:[%s2839_s25 + $0x68] sm:$0xff] }
 0x131   : > { %2220 = vmatprep.subr.mxu0 %v691_v11  ;;  %2250 = vmatprep.subr.mxu1 %v702_v10 }
 0x132   : > { %2251 = vmatpush3.msra.mxu1 %v702_v10 }
 0x134   : > { %2221 = vmatpush3.xpose.msra.mxu0 %v691_v11 }
 0x135   : > { %2222 = vmatprep.subr.mxu0 %v689_v12 }
 0x138   : > { %2223 = vmatpush3.xpose.msra.mxu0 %v689_v12  ;;  %v3010_v12 = vld [vmem:[#allocation3 + $0x28] sm:$0xff] }
 0x13b   : > { %2225 = vmatmul.mubr.f32.vlgmr.msra.gmra.mxu0 %v706_v13 }
 0x13c   : > { %2227 = vmatprep.mubr.f32.mxu0 %v707_v14  ;;  %v700_v14 = vld [vmem:[%s2839_s25 + $0x58] sm:$0xff] }
 0x13d   : > { %2252 = vmatprep.subr.mxu1 %v700_v14 }
 0x13e   : > { %2253 = vmatpush3.msra.mxu1 %v700_v14 }
 0x13f   : > { %2228 = vmatmul.mubr.f32.gmra.mxu0 %v708_v15 }
 0x140   : > { %2230 = vmatprep.mubr.f32.mxu0 %v709_v16 }
 0x143   : > { %2231 = vmatmul.mubr.f32.gmra.mxu0 %v710_v17  ;;  %v3018_v17 = vld [vmem:[#allocation3 + $0x30] sm:$0xff] }
 0x144   : > { %2233 = vmatprep.mubr.f32.mxu0 %v711_v18  ;;  %v698_v18 = vld [vmem:[%s2839_s25 + $0x48] sm:$0xff] }
 0x145   : > { %2254 = vmatprep.subr.mxu1 %v698_v18 }
 0x146   : > { %2255 = vmatpush3.msra.mxu1 %v698_v18 }
 0x147   : > { %2234 = vmatmul.mubr.f32.gmra.mxu0 %v712_v19 }
 0x148   : > { %2236 = vmatprep.mubr.f32.mxu0 %v713_v20  ;;  %v3025_v20 = vld [vmem:[#allocation3 + $0x38] sm:$0xff] }
 0x14b   : > { %2237 = vmatmul.mubr.f32.gmra.mxu0 %v714_v21 }
 0x14c   : > { %2239 = vmatprep.mubr.f32.mxu0 %v715_v22  ;;  %v696_v22 = vld [vmem:[%s2839_s25 + $0x38] sm:$0xff] }
 0x14d   : > { %2256 = vmatprep.subr.mxu1 %v696_v22 }
 0x14e   : > { %2257 = vmatpush3.msra.mxu1 %v696_v22 }
 0x14f   : > { %2240 = vmatmul.mubr.f32.gmra.mxu0 %v716_v23 }
 0x150   : > { %2242 = vmatprep.mubr.f32.mxu0 %v717_v24 }
 0x153   : > { %2243 = vmatmul.mubr.f32.gmra.mxu0 %v718_v25  ;;  %v3032_v25 = vld [vmem:[#allocation3 + $0x40] sm:$0xff] }
 0x154   : > { %2245 = vmatprep.mubr.f32.mxu0 %v719_v26  ;;  %v694_v26 = vld [vmem:[%s2839_s25 + $0x28] sm:$0xff] }
 0x155   : > { %2258 = vmatprep.subr.mxu1 %v694_v26 }
 0x156   : > { %2259 = vmatpush3.msra.mxu1 %v694_v26 }
 0x157   : > { %2246 = vmatmul.mubr.f32.gmra.mxu0 %v720_v27 }
 0x1fb   : > { %v2921_v28 = vpop.f32.mrf.mxu0 }
 0x1fc   : > { %v886_v34 = vsel %vm882_vm3, %v2921_v28, -inf }
 0x1fd   : > { %v2923_v29 = vpop.f32.mrf.mxu0 }
 0x1fe   : > { %v883_v30 = vsel %vm882_vm3, %v2923_v29, -inf }
 0x1ff   : > { %884 = vmax.xlane.f32.xlu0 %v883_v30  ;;  %v2927_v31 = vpop.f32.mrf.mxu0 }
 0x200   : > { %v892_v32 = vsel %vm882_vm3, %v2927_v31, -inf }
 0x201   : > { %893 = vmax.xlane.f32.xlu1 %v892_v32  ;;  %v2931_v33 = vpop.f32.mrf.mxu0  ;;  %v875_v32 = vld [vmem:[#allocation3 + $0x48] sm:$0xff] }
 0x202   : > { %v889_v35 = vsel %vm882_vm3, %v2931_v33, -inf }
 0x203   : > { %887 = vmax.xlane.f32.xlu0 %v886_v34  ;;  %v2937_v36 = vpop.f32.mrf.mxu0 }
 0x204   : > { %v898_v38 = vsel %vm882_vm3, %v2937_v36, -inf }
 0x205   : > { %890 = vmax.xlane.f32.xlu1 %v889_v35  ;;  %v2939_v37 = vpop.f32.mrf.mxu0  ;;  %v692_v35 = vld [vmem:[%s2839_s25 + $0x18] sm:$0xff] }
 0x206   : > { %v895_v39 = vsel %vm882_vm3, %v2939_v37, -inf  ;;  %2260 = vmatprep.subr.mxu1 %v692_v35 }
 0x207   : > { %v2945_v40 = vpop.f32.mrf.mxu0  ;;  %896 = vmax.xlane.f32.xlu0 %v895_v39  ;;  %2261 = vmatpush3.msra.mxu1 %v692_v35 }
 0x208   : > { %v904_v42 = vsel %vm882_vm3, %v2945_v40, -inf }
 0x209   : > { %899 = vmax.xlane.f32.xlu1 %v898_v38  ;;  %v2947_v41 = vpop.f32.mrf.mxu0 }
 0x20a   : > { %v901_v43 = vsel %vm882_vm3, %v2947_v41, -inf }
 0x20b   : > { %v2953_v45 = vpop.f32.mrf.mxu0  ;;  %902 = vmax.xlane.f32.xlu0 %v901_v43  ;;  %v690_v43 = vld [vmem:[%s2839_s25 + $0x8] sm:$0xff] }
 0x20c   : > { %v910_v47 = vsel %vm882_vm3, %v2953_v45, -inf  ;;  %2262 = vmatprep.subr.mxu1 %v690_v43 }
 0x20d   : > { %905 = vmax.xlane.f32.xlu1 %v904_v42  ;;  %v2955_v46 = vpop.f32.mrf.mxu0  ;;  %v3044_v42 = vld [vmem:[#allocation3 + $0x50] sm:$0xff]  ;;  %2263 = vmatpush3.msra.mxu1 %v690_v43 }
 0x20e   : > { %v907_v48 = vsel %vm882_vm3, %v2955_v46, -inf }
 0x20f   : > { %v2961_v49 = vpop.f32.mrf.mxu0  ;;  %908 = vmax.xlane.f32.xlu0 %v907_v48 }
 0x210   : > { %v916_v51 = vsel %vm882_vm3, %v2961_v49, -inf }
 0x211   : > { %911 = vmax.xlane.f32.xlu1 %v910_v47  ;;  %v2963_v50 = vpop.f32.mrf.mxu0 }
 0x212   : > { %v913_v52 = vsel %vm882_vm3, %v2963_v50, -inf }
 0x213   : > { %v2969_v53 = vpop.f32.mrf.mxu0  ;;  %914 = vmax.xlane.f32.xlu0 %v913_v52 }
 0x214   : > { %v922_v55 = vsel %vm882_vm3, %v2969_v53, -inf }
 0x215   : > { %917 = vmax.xlane.f32.xlu1 %v916_v51  ;;  %v2971_v54 = vpop.f32.mrf.mxu0  ;;  %v877_v51 = vld [vmem:[#allocation3 + $0x58] sm:$0xff] }
 0x216   : > { %v919_v56 = vsel %vm882_vm3, %v2971_v54, -inf }
 0x217   : > { %v2977_v57 = vpop.f32.mrf.mxu0  ;;  %920 = vmax.xlane.f32.xlu0 %v919_v56 }
 0x218   : > { %v928_v59 = vsel %vm882_vm3, %v2977_v57, -inf }
 0x219   : > { %923 = vmax.xlane.f32.xlu1 %v922_v55  ;;  %v2979_v58 = vpop.f32.mrf.mxu0 }
 0x21a   : > { %v925_v60 = vsel %vm882_vm3, %v2979_v58, -inf }
 0x21b   : > { %926 = vmax.xlane.f32.xlu0 %v925_v60 }
 0x21d   : > { %929 = vmax.xlane.f32.xlu1 %v928_v59  ;;  %v3055_v59 = vld [vmem:[#allocation3 + $0x60] sm:$0xff] }
 0x288   : > { %v885_v62 = vpop.xlane.xlu0 %884 }
 0x289   : > { %v2990_v0 = vmax.f32 %v2985_v61, %v885_v62 }
 0x28a   : > { %v894_v1 = vpop.xlane.xlu1 %893 }
 0x28b   : > { %1461 = vst.msk [vmem:[#allocation3] sm:$0xff] %vm1460_vm4, %v2990_v0  ;;  %v2995_v3 = vmax.f32 %v2987_v63, %v894_v1  ;;  %997 = vperm.xlu0 %2471, %v2990_v0   ;;  %v879_v1 = vld [vmem:[#allocation3 + $0x68] sm:$0xff]  ;;  %v947_v14 = vsub.f32 %v2985_v61, %v2990_v0 }
 0x28c   : > { %v888_v4 = vpop.xlane.xlu0 %887 }
 0x28d   : > { %1464 = vst.msk [vmem:[#allocation3 + $0x18] sm:$0xff] %vm1460_vm4, %v2995_v3  ;;  %v932_v7 = vmax.f32 %v867_v2, %v888_v4  ;;  %v950_v44 = vsub.f32 %v2987_v63, %v2995_v3  ;;  %v963_v22 = vmul.f32 1.442695, %v947_v14 }
 0x28e   : > { %v891_v8 = vpop.xlane.xlu1 %890 }
 0x28f   : > { %1462 = vst.msk [vmem:[#allocation3 + $0x8] sm:$0xff] %vm1460_vm4, %v932_v7  ;;  %v3008_v11 = vmax.f32 %v2998_v5, %v891_v8  ;;  %1002 = vperm.xlu1 %2472, %v932_v7   ;;  %v948_v27 = vsub.f32 %v867_v2, %v932_v7  ;;  %v969_v60 = vmul.f32 1.442695, %v950_v44 }
 0x290   : > { %v897_v13 = vpop.xlane.xlu0 %896 }
 0x291   : > { %1463 = vst.msk [vmem:[#allocation3 + $0x10] sm:$0xff] %vm1460_vm4, %v3008_v11  ;;  %v3016_v15 = vmax.f32 %v3003_v9, %v897_v13  ;;  %v965_v47 = vmul.f32 1.442695, %v948_v27  ;;  %v949_v61 = vsub.f32 %v2998_v5, %v3008_v11 }
 0x292   : > { %v900_v16 = vpop.xlane.xlu1 %899 }
 0x293   : > { %v936_v19 = vmax.f32 %v3010_v12, %v900_v16  ;;  %1012 = vperm.xlu1 %2472, %v2995_v3   ;;  %1465 = vst.msk [vmem:[#allocation3 + $0x20] sm:$0xff] %vm1460_vm4, %v3016_v15  ;;  %2473 = vpow2.f32 %v965_v47  ;;  %v967_v27 = vmul.f32 1.442695, %v949_v61 }
 0x294   : > { %v903_v21 = vpop.xlane.xlu0 %902  ;;  %2475 = vpow2.f32 %v969_v60 }
 0x295   : > { %1466 = vst.msk [vmem:[#allocation3 + $0x28] sm:$0xff] %vm1460_vm4, %v936_v19  ;;  %v3030_v23 = vmax.f32 %v3018_v17, %v903_v21  ;;  %v952_v62 = vsub.f32 %v3010_v12, %v936_v19  ;;  %v881_v12 = vld [vmem:[#allocation3 + $0x78] sm:$0xff] }
 0x296   : > { %v906_v24 = vpop.xlane.xlu1 %905 }
 0x297   : > { %v938_v30 = vmax.f32 %v3025_v20, %v906_v24  ;;  %1007 = vperm.xlu1 %2472, %v3008_v11   ;;  %1467 = vst.msk [vmem:[#allocation3 + $0x30] sm:$0xff] %vm1460_vm4, %v3030_v23  ;;  %v973_v7 = vmul.f32 1.442695, %v952_v62  ;;  %v953_v35 = vsub.f32 %v3018_v17, %v3030_v23 }
 0x298   : > { %v909_v34 = vpop.xlane.xlu0 %908 }
 0x299   : > { %1468 = vst.msk [vmem:[#allocation3 + $0x38] sm:$0xff] %vm1460_vm4, %v938_v30  ;;  %v3042_v38 = vmax.f32 %v3032_v25, %v909_v34  ;;  %v954_v8 = vsub.f32 %v3025_v20, %v938_v30  ;;  %2477 = vpow2.f32 %v973_v7 }
 0x29a   : > { %v912_v39 = vpop.xlane.xlu1 %911 }
 0x29b   : > { %v940_v48 = vmax.f32 %v875_v32, %v912_v39  ;;  %1022 = vperm.xlu1 %2472, %v936_v19   ;;  %1469 = vst.msk [vmem:[#allocation3 + $0x40] sm:$0xff] %vm1460_vm4, %v3042_v38  ;;  %v977_v19 = vmul.f32 1.442695, %v954_v8 }
 0x29c   : > { %v915_v52 = vpop.xlane.xlu0 %914 }
 0x29d   : > { %1470 = vst.msk [vmem:[#allocation3 + $0x48] sm:$0xff] %vm1460_vm4, %v940_v48  ;;  %1042 = vperm.xlu0 %2471, %v940_v48   ;;  %v3053_v55 = vmax.f32 %v3044_v42, %v915_v52  ;;  %v956_v20 = vsub.f32 %v875_v32, %v940_v48  ;;  %2479 = vpow2.f32 %v977_v19 }
 0x29e   : > { %v918_v56 = vpop.xlane.xlu1 %917  ;;  %2481 = vpow2.f32 %v963_v22 }
 0x29f   : > { %v942_v63 = vmax.f32 %v877_v51, %v918_v56  ;;  %1017 = vperm.xlu1 %2472, %v3016_v15   ;;  %1471 = vst.msk [vmem:[#allocation3 + $0x50] sm:$0xff] %vm1460_vm4, %v3053_v55  ;;  %v981_v0 = vmul.f32 1.442695, %v956_v20 }
 0x2a0   : > { %v921_v2 = vpop.xlane.xlu0 %920  ;;  %v2474_v26 = vpop.eup %2473 }
 0x2a1   : > { %1472 = vst.msk [vmem:[#allocation3 + $0x58] sm:$0xff] %vm1460_vm4, %v942_v63  ;;  %1052 = vperm.xlu0 %2471, %v942_v63   ;;  %v3063_v3 = vmax.f32 %v3055_v59, %v921_v2  ;;  %v958_v24 = vsub.f32 %v877_v51, %v942_v63  ;;  %2483 = vpow2.f32 %v981_v0  ;;  %v2476_v5 = vpop.eup %2475 }
 0x2a2   : > { %v924_v4 = vpop.xlane.xlu1 %923  ;;  %2485 = vpow2.f32 %v967_v27 }
 0x2a3   : > { %v944_v10 = vmax.f32 %v879_v1, %v924_v4  ;;  %1032 = vperm.xlu1 %2472, %v938_v30   ;;  %1473 = vst.msk [vmem:[#allocation3 + $0x60] sm:$0xff] %vm1460_vm4, %v3063_v3  ;;  %v951_v30 = vsub.f32 %v3003_v9, %v3016_v15  ;;  %v985_v32 = vmul.f32 1.442695, %v958_v24  ;;  %v975_v9 = vmul.f32 1.442695, %v953_v35 }
 0x2a4   : > { %v927_v13 = vpop.xlane.xlu0 %926  ;;  %v955_v15 = vsub.f32 %v3032_v25, %v3042_v38  ;;  %v959_v25 = vsub.f32 %v3055_v59, %v3063_v3 }
 0x2a5   : > { %1474 = vst.msk [vmem:[#allocation3 + $0x68] sm:$0xff] %vm1460_vm4, %v944_v10  ;;  %1062 = vperm.xlu0 %2471, %v944_v10   ;;  %v3074_v16 = vmax.f32 %v3065_v6, %v927_v13  ;;  %v960_v34 = vsub.f32 %v879_v1, %v944_v10  ;;  %v971_v11 = vmul.f32 1.442695, %v951_v30  ;;  %2487 = vpow2.f32 %v985_v32 }
 0x2a6   : > { %v930_v18 = vpop.xlane.xlu1 %929  ;;  %v2478_v44 = vpop.eup %2477  ;;  %v979_v17 = vmul.f32 1.442695, %v955_v15  ;;  %v987_v62 = vmul.f32 1.442695, %v959_v25 }
 0x2a7   : > { %v946_v21 = vmax.f32 %v881_v12, %v930_v18  ;;  %1027 = vperm.xlu1 %2472, %v3030_v23   ;;  %1475 = vst.msk [vmem:[#allocation3 + $0x70] sm:$0xff] %vm1460_vm4, %v3074_v16  ;;  %v989_v39 = vmul.f32 1.442695, %v960_v34  ;;  %2489 = vpow2.f32 %v971_v11  ;;  %v957_v23 = vsub.f32 %v3044_v42, %v3053_v55 }
 0x2a8   : > { %v961_v63 = vsub.f32 %v3065_v6, %v3074_v16 }
 0x2a9   : > { %1476 = vst.msk [vmem:[#allocation3 + $0x78] sm:$0xff] %vm1460_vm4, %v946_v21  ;;  %1072 = vperm.xlu0 %2471, %v946_v21   ;;  %v962_v43 = vsub.f32 %v881_v12, %v946_v21  ;;  %2491 = vpow2.f32 %v989_v39  ;;  %v983_v56 = vmul.f32 1.442695, %v957_v23 }
 0x2aa   : > { %v2480_v48 = vpop.eup %2479  ;;  %2493 = vpow2.f32 %v975_v9  ;;  %v991_v1 = vmul.f32 1.442695, %v961_v63 }
 0x2ab   : > { %1037 = vperm.xlu1 %2472, %v3042_v38   ;;  %v993_v47 = vmul.f32 1.442695, %v962_v43  ;;  %v2482_v51 = vpop.eup %2481 }
 0x2ad   : > { %1146 = vperm.xlu0 %2471, %v2474_v26   ;;  %2495 = vpow2.f32 %v993_v47 }
 0x2ae   : > { %v2484_v52 = vpop.eup %2483  ;;  %2497 = vpow2.f32 %v979_v17 }
 0x2af   : > { %1047 = vperm.xlu1 %2472, %v3053_v55   ;;  %v2486_v38 = vpop.eup %2485  ;;  %2499 = vpow2.f32 %v983_v56 }
 0x2b0   : > { %2501 = vpow2.f32 %v987_v62 }
 0x2b1   : > { %1156 = vperm.xlu0 %2471, %v2476_v5   ;;  %2503 = vpow2.f32 %v991_v1 }
 0x2b2   : > { %v2488_v60 = vpop.eup %2487 }
 0x2b3   : > { %1057 = vperm.xlu1 %2472, %v3063_v3  }
 0x2b4   : > { %v2490_v42 = vpop.eup %2489 }
 0x2b5   : > { %1166 = vperm.xlu0 %2471, %v2478_v44  }
 0x2b6   : > { %v2492_v55 = vpop.eup %2491 }
 0x2b7   : > { %1067 = vperm.xlu1 %2472, %v3074_v16   ;;  %v2494_v2 = vpop.eup %2493 }
 0x2b9   : > { %1176 = vperm.xlu0 %2471, %v2480_v48  }
 0x2ba   : > { %v2496_v4 = vpop.eup %2495 }
 0x2bb   : > { %1141 = vperm.xlu1 %2472, %v2482_v51   ;;  %v2498_v59 = vpop.eup %2497 }
 0x2bc   : > { %v2500_v3 = vpop.eup %2499 }
 0x2bd   : > { %1186 = vperm.xlu0 %2471, %v2484_v52   ;;  %v2502_v7 = vpop.eup %2501 }
 0x2be   : > { %v2504_v8 = vpop.eup %2503 }
 0x2bf   : > { %1151 = vperm.xlu1 %2472, %v2486_v38  }
 0x2c1   : > { %1196 = vperm.xlu0 %2471, %v2488_v60  }
 0x2c3   : > { %1161 = vperm.xlu1 %2472, %v2490_v42  }
 0x2c5   : > { %1206 = vperm.xlu0 %2471, %v2492_v55  }
 0x2c7   : > { %1171 = vperm.xlu1 %2472, %v2494_v2  }
 0x2c9   : > { %1216 = vperm.xlu0 %2471, %v2496_v4  }
 0x2cb   : > { %1181 = vperm.xlu1 %2472, %v2498_v59  }
 0x2cf   : > { %1191 = vperm.xlu1 %2472, %v2500_v3  }
 0x2d3   : > { %1201 = vperm.xlu1 %2472, %v2502_v7  }
 0x2d7   : > { %1211 = vperm.xlu1 %2472, %v2504_v8  }
 0x306   : > { %v998_v6 = vpop.permute.xlu0 %997 }
 0x307   : > { %v1075_v10 = vsub.f32 %v2923_v29, %v998_v6 }
 0x309   : > { %v1091_v12 = vmul.f32 1.442695, %v1075_v10  ;;  %v1124_v10 = vld [vmem:[#allocation4 + $0x68] sm:$0xff] }
 0x30a   : > { %v1003_v13 = vpop.permute.xlu1 %1002 }
 0x30b   : > { %2505 = vpow2.f32 %v1091_v12  ;;  %v1076_v14 = vsub.f32 %v2921_v28, %v1003_v13  ;;  %v1123_v13 = vld [vmem:[#allocation4 + $0x28] sm:$0xff] }
 0x30d   : > { %v1093_v16 = vmul.f32 1.442695, %v1076_v14 }
 0x30e   : > { %v1013_v18 = vpop.permute.xlu1 %1012 }
 0x30f   : > { %2507 = vpow2.f32 %v1093_v16  ;;  %v1078_v19 = vsub.f32 %v2927_v31, %v1013_v18 }
 0x311   : > { %v1097_v22 = vmul.f32 1.442695, %v1078_v19 }
 0x312   : > { %v1008_v20 = vpop.permute.xlu1 %1007 }
 0x313   : > { %v1077_v21 = vsub.f32 %v2931_v33, %v1008_v20 }
 0x315   : > { %v1095_v61 = vmul.f32 1.442695, %v1077_v21 }
 0x316   : > { %v1023_v0 = vpop.permute.xlu1 %1022 }
 0x317   : > { %2509 = vpow2.f32 %v1095_v61  ;;  %v1080_v29 = vsub.f32 %v2937_v36, %v1023_v0  ;;  %v1126_v0 = vld [vmem:[#allocation4 + $0x40] sm:$0xff] }
 0x318   : > { %v2506_v24 = vpop.eup %2505  ;;  %2511 = vpow2.f32 %v1097_v22  ;;  %v1043_v28 = vpop.permute.xlu0 %1042 }
 0x319   : > { %2264 = vmatprep.mubr.msk.f32.mxu1 %vm882_vm3, %v2506_v24  ;;  %v1101_v32 = vmul.f32 1.442695, %v1080_v29  ;;  %v1084_v39 = vsub.f32 %v2953_v45, %v1043_v28  ;;  %v1125_v29 = vld [vmem:[#allocation4 + $0x10] sm:$0xff] }
 0x31a   : > { %v1018_v26 = vpop.permute.xlu1 %1017 }
 0x31b   : > { %v1079_v27 = vsub.f32 %v2939_v37, %v1018_v26 }
 0x31c   : > { %v2508_v30 = vpop.eup %2507  ;;  %v1053_v5 = vpop.permute.xlu0 %1052 }
 0x31d   : > { %v1099_v31 = vmul.f32 1.442695, %v1079_v27  ;;  %2265 = vmatmul.mubr.msk.f32.vlgmr.msra.gmra.mxu1 %vm882_vm3, %v2508_v30  ;;  %v1086_v48 = vsub.f32 %v2961_v49, %v1053_v5 }
 0x31e   : > { %v1033_v33 = vpop.permute.xlu1 %1032 }
 0x31f   : > { %2513 = vpow2.f32 %v1099_v31  ;;  %v1082_v34 = vsub.f32 %v2945_v40, %v1033_v33  ;;  %v1109_v40 = vmul.f32 1.442695, %v1084_v39  ;;  %v1113_v51 = vmul.f32 1.442695, %v1086_v48  ;;  %v1129_v48 = vld [vmem:[#allocation4 + $0x70] sm:$0xff] }
 0x320   : > { %2515 = vpow2.f32 %v1101_v32  ;;  %v1063_v15 = vpop.permute.xlu0 %1062 }
 0x321   : > { %v1105_v43 = vmul.f32 1.442695, %v1082_v34  ;;  %v1088_v52 = vsub.f32 %v2969_v53, %v1063_v15  ;;  %v1128_v34 = vld [vmem:[#allocation4 + $0x30] sm:$0xff] }
 0x322   : > { %v1028_v11 = vpop.permute.xlu1 %1027 }
 0x323   : > { %v1081_v36 = vsub.f32 %v2947_v41, %v1028_v11  ;;  %v1117_v60 = vmul.f32 1.442695, %v1088_v52  ;;  %v1127_v11 = vld [vmem:[#allocation4 + $0x48] sm:$0xff] }
 0x324   : > { %v2510_v35 = vpop.eup %2509  ;;  %v1073_v25 = vpop.permute.xlu0 %1072 }
 0x325   : > { %v2512_v44 = vpop.eup %2511  ;;  %v1103_v37 = vmul.f32 1.442695, %v1081_v36  ;;  %2267 = vmatprep.mubr.msk.f32.mxu1 %vm882_vm3, %v2510_v35 }
 0x326   : > { %v1038_v9 = vpop.permute.xlu1 %1037  ;;  %2268 = vmatmul.mubr.msk.f32.gmra.mxu1 %vm882_vm3, %v2512_v44 }
 0x327   : > { %2517 = vpow2.f32 %v1103_v37  ;;  %v1083_v47 = vsub.f32 %v2955_v46, %v1038_v9 }
 0x328   : > { %2519 = vpow2.f32 %v1105_v43  ;;  %v1147_v6 = vpop.permute.xlu0 %1146 }
 0x329   : > { %v1107_v41 = vmul.f32 1.442695, %v1083_v47  ;;  %v1220_v14 = vmul.f32 %v1147_v6, %v1124_v10  ;;  %v1130_v47 = vld [vmem:[#allocation4 + $0x38] sm:$0xff]  ;;  %v1138_v10 = vld [vmem:[#allocation4 + $0x50] sm:$0xff] }
 0x32a   : > { %v1048_v17 = vpop.permute.xlu1 %1047 }
 0x32b   : > { %2521 = vpow2.f32 %v1107_v41  ;;  %v1085_v45 = vsub.f32 %v2963_v50, %v1048_v17  ;;  %v1090_v50 = vsub.f32 %v2977_v57, %v1073_v25  ;;  %v1132_v17 = vld [vmem:[#allocation4 + $0x78] sm:$0xff] }
 0x32c   : > { %v2514_v23 = vpop.eup %2513  ;;  %2523 = vpow2.f32 %v1109_v40  ;;  %v1157_v18 = vpop.permute.xlu0 %1156 }
 0x32d   : > { %v2516_v56 = vpop.eup %2515  ;;  %v1111_v38 = vmul.f32 1.442695, %v1085_v45  ;;  %2270 = vmatprep.mubr.msk.f32.mxu1 %vm882_vm3, %v2514_v23  ;;  %v1121_v55 = vmul.f32 1.442695, %v1090_v50  ;;  %v1222_v26 = vmul.f32 %v1157_v18, %v1126_v0  ;;  %v1137_v18 = vld [vmem:[#allocation4 + $0x60] sm:$0xff] }
 0x32e   : > { %v1058_v46 = vpop.permute.xlu1 %1057  ;;  %2271 = vmatmul.mubr.msk.f32.gmra.mxu1 %vm882_vm3, %v2516_v56  ;;  %v1131_v56 = vld [vmem:[#allocation4 + $0x20] sm:$0xff] }
 0x32f   : > { %2525 = vpow2.f32 %v1111_v38  ;;  %v1087_v49 = vsub.f32 %v2971_v54, %v1058_v46 }
 0x330   : > { %2527 = vpow2.f32 %v1113_v51  ;;  %v1167_v24 = vpop.permute.xlu0 %1166 }
 0x331   : > { %v1115_v62 = vmul.f32 1.442695, %v1087_v49  ;;  %v1224_v35 = vmul.f32 %v1167_v24, %v1128_v34 }
 0x332   : > { %v1068_v63 = vpop.permute.xlu1 %1067 }
 0x333   : > { %2529 = vpow2.f32 %v1115_v62  ;;  %v1089_v53 = vsub.f32 %v2979_v58, %v1068_v63 }
 0x334   : > { %v2518_v42 = vpop.eup %2517  ;;  %2531 = vpow2.f32 %v1117_v60  ;;  %v1177_v5 = vpop.permute.xlu0 %1176  ;;  %v1134_v60 = vld [vmem:[#allocation4 + $0x58] sm:$0xff] }
 0x335   : > { %v2520_v1 = vpop.eup %2519  ;;  %v1119_v2 = vmul.f32 1.442695, %v1089_v53  ;;  %2273 = vmatprep.mubr.msk.f32.mxu1 %vm882_vm3, %v2518_v42  ;;  %v1226_v41 = vmul.f32 %v1177_v5, %v1130_v47  ;;  %v1133_v42 = vld [vmem:[#allocation4 + $0x18] sm:$0xff] }
 0x336   : > { %2274 = vmatmul.mubr.msk.f32.gmra.mxu1 %vm882_vm3, %v2520_v1  ;;  %v1142_v12 = vpop.permute.xlu1 %1141 }
 0x337   : > { %2533 = vpow2.f32 %v1119_v2  ;;  %v1219_v19 = vmul.f32 %v1142_v12, %v1123_v13 }
 0x338   : > { %v2522_v54 = vpop.eup %2521  ;;  %2535 = vpow2.f32 %v1121_v55  ;;  %v1187_v37 = vpop.permute.xlu0 %1186 }
 0x339   : > { %v2524_v4 = vpop.eup %2523  ;;  %2276 = vmatprep.mubr.msk.f32.mxu1 %vm882_vm3, %v2522_v54  ;;  %v1228_v46 = vmul.f32 %v1187_v37, %v1132_v17  ;;  %v1136_v54 = vld [vmem:[#allocation4 + $0x8] sm:$0xff] }
 0x33a   : > { %2277 = vmatmul.mubr.msk.f32.gmra.mxu1 %vm882_vm3, %v2524_v4  ;;  %v1152_v22 = vpop.permute.xlu1 %1151 }
 0x33b   : > { %v1221_v30 = vmul.f32 %v1152_v22, %v1125_v29 }
 0x33c   : > { %v2526_v57 = vpop.eup %2525  ;;  %v1197_v45 = vpop.permute.xlu0 %1196 }
 0x33d   : > { %v2528_v59 = vpop.eup %2527  ;;  %2279 = vmatprep.mubr.msk.f32.mxu1 %vm882_vm3, %v2526_v57  ;;  %v1230_v1 = vmul.f32 %v1197_v45, %v1134_v60 }
 0x33e   : > { %2280 = vmatmul.mubr.msk.f32.gmra.mxu1 %vm882_vm3, %v2528_v59  ;;  %v1162_v28 = vpop.permute.xlu1 %1161 }
 0x33f   : > { %v1223_v43 = vmul.f32 %v1162_v28, %v1127_v11 }
 0x340   : > { %v2530_v58 = vpop.eup %2529  ;;  %v1207_v53 = vpop.permute.xlu0 %1206 }
 0x341   : > { %v2532_v3 = vpop.eup %2531  ;;  %2282 = vmatprep.mubr.msk.f32.mxu1 %vm882_vm3, %v2530_v58 }
 0x342   : > { %2283 = vmatmul.mubr.msk.f32.gmra.mxu1 %vm882_vm3, %v2532_v3  ;;  %v1172_v36 = vpop.permute.xlu1 %1171  ;;  %v1135_v3 = vld [vmem:[#allocation4] sm:$0xff] }
 0x343   : > { %v1225_v51 = vmul.f32 %v1172_v36, %v1129_v48 }
 0x344   : > { %v2534_v7 = vpop.eup %2533  ;;  %v1217_v12 = vpop.permute.xlu0 %1216 }
 0x345   : > { %v2536_v8 = vpop.eup %2535  ;;  %2285 = vmatprep.mubr.msk.f32.mxu1 %vm882_vm3, %v2534_v7 }
 0x346   : > { %2286 = vmatmul.mubr.msk.f32.gmra.mxu1 %vm882_vm3, %v2536_v8  ;;  %v1182_v40 = vpop.permute.xlu1 %1181  ;;  %v1232_v8 = vmul.f32 %v1207_v53, %v1136_v54 }
 0x347   : > { %v1227_v62 = vmul.f32 %v1182_v40, %v1131_v56 }
 0x34a   : > { %v1192_v25 = vpop.permute.xlu1 %1191 }
 0x34b   : > { %v1229_v59 = vmul.f32 %v1192_v25, %v1133_v42 }
 0x34e   : > { %v1202_v4 = vpop.permute.xlu1 %1201 }
 0x3dd   : > { %v2266_v16 = vpop.f32.mrf.mxu1 }
 0x3de   : > { %v1429_v20 = vadd.f32 %v2266_v16, %v1220_v14  ;;  %v1231_v14 = vmul.f32 %v1202_v4, %v1135_v3 }
 0x3df   : > { %v1349_v21 = vpop.f32.mrf.mxu1 }
 0x3e0   : > { %1445 = vst [vmem:[#allocation4 + $0x68] sm:$0xff] %v1429_v20  ;;  %v1428_v61 = vadd.f32 %v1349_v21, %v1219_v19  ;;  %v1212_v19 = vpop.permute.xlu1 %1211  ;;  %v1234_v21 = vmul.f32 %v1217_v12, %v1138_v10 }
 0x3e1   : > { %v1233_v0 = vmul.f32 %v1212_v19, %v1137_v18 }
 0x3e2   : > { %1444 = vst [vmem:[#allocation4 + $0x28] sm:$0xff] %v1428_v61 }
 0x3e6   : > { %v2269_v27 = vpop.f32.mrf.mxu1 }
 0x3e7   : > { %v1431_v32 = vadd.f32 %v2269_v27, %v1222_v26 }
 0x3e8   : > { %v1359_v31 = vpop.f32.mrf.mxu1 }
 0x3e9   : > { %1447 = vst [vmem:[#allocation4 + $0x40] sm:$0xff] %v1431_v32  ;;  %v1430_v33 = vadd.f32 %v1359_v31, %v1221_v30 }
 0x3eb   : > { %1446 = vst [vmem:[#allocation4 + $0x10] sm:$0xff] %v1430_v33 }
 0x3ee   : > { %v2272_v39 = vpop.f32.mrf.mxu1 }
 0x3ef   : > { %v1433_v44 = vadd.f32 %v2272_v39, %v1224_v35 }
 0x3f0   : > { %v1369_v9 = vpop.f32.mrf.mxu1 }
 0x3f1   : > { %1449 = vst [vmem:[#allocation4 + $0x30] sm:$0xff] %v1433_v44  ;;  %v1432_v15 = vadd.f32 %v1369_v9, %v1223_v43 }
 0x3f3   : > { %1448 = vst [vmem:[#allocation4 + $0x48] sm:$0xff] %v1432_v15 }
 0x3f6   : > { %v2275_v23 = vpop.f32.mrf.mxu1 }
 0x3f7   : > { %v1435_v52 = vadd.f32 %v2275_v23, %v1226_v41 }
 0x3f8   : > { %v1379_v38 = vpop.f32.mrf.mxu1 }
 0x3f9   : > { %1451 = vst [vmem:[#allocation4 + $0x38] sm:$0xff] %v1435_v52  ;;  %v1434_v49 = vadd.f32 %v1379_v38, %v1225_v51 }
 0x3fa   : > { %v2278_v50 = vpop.f32.mrf.mxu1 }
 0x3fb   : > { %1450 = vst [vmem:[#allocation4 + $0x70] sm:$0xff] %v1434_v49  ;;  %v1437_v63 = vadd.f32 %v2278_v50, %v1228_v46 }
 0x3fc   : > { %v1389_v55 = vpop.f32.mrf.mxu1 }
 0x3fd   : > { %1453 = vst [vmem:[#allocation4 + $0x78] sm:$0xff] %v1437_v63  ;;  %v1436_v2 = vadd.f32 %v1389_v55, %v1227_v62 }
 0x3fe   : > { %v2281_v57 = vpop.f32.mrf.mxu1 }
 0x3ff   : > { %1452 = vst [vmem:[#allocation4 + $0x20] sm:$0xff] %v1436_v2  ;;  %v1439_v58 = vadd.f32 %v2281_v57, %v1230_v1 }
 0x400   : > { %v1399_v7 = vpop.f32.mrf.mxu1 }
 0x401   : > { %1455 = vst [vmem:[#allocation4 + $0x58] sm:$0xff] %v1439_v58  ;;  %v1438_v6 = vadd.f32 %v1399_v7, %v1229_v59 }
 0x402   : > { %v2284_v13 = vpop.f32.mrf.mxu1 }
 0x403   : > { %1454 = vst [vmem:[#allocation4 + $0x18] sm:$0xff] %v1438_v6  ;;  %v1441_v16 = vadd.f32 %v2284_v13, %v1232_v8 }
 0x404   : > { %v1409_v20 = vpop.f32.mrf.mxu1 }
 0x405   : > { %1457 = vst [vmem:[#allocation4 + $0x8] sm:$0xff] %v1441_v16  ;;  %v1440_v22 = vadd.f32 %v1409_v20, %v1231_v14 }
 0x406   : > { %v2287_v61 = vpop.f32.mrf.mxu1 }
 0x407   : > { %1456 = vst [vmem:[#allocation4] sm:$0xff] %v1440_v22  ;;  %v1443_v24 = vadd.f32 %v2287_v61, %v1234_v21  ;;  %1480 = sbr.rel (%p2078_p12) target bundleno = 1412 (0x584), region = 64 }
 0x408   : > { %v1419_v29 = vpop.f32.mrf.mxu1 }
 0x409   : > { %1459 = vst [vmem:[#allocation4 + $0x50] sm:$0xff] %v1443_v24  ;;  %v1442_v26 = vadd.f32 %v1419_v29, %v1233_v0 }
 0x40b   : > { %1458 = vst [vmem:[#allocation4 + $0x60] sm:$0xff] %v1442_v26 }
 0x40c   : > { %v3131_v28 = vld [vmem:[#allocation4 + $0x68] sm:$0xff]  ;;  %v3135_v30 = vld [vmem:[#allocation4 + $0x78] sm:$0xff]  ;;  %v2689_v32 = vmov 127   ;;  %v3138_v31 = vld [vmem:[#allocation4 + $0x20] sm:$0xff]  ;;  %vm1887_vm5 = vcmask 31744  }
 0x40d   : > { %v3133_v27 = vld [vmem:[#allocation4 + $0x28] sm:$0xff]  ;;  %2538 = vset.pattern.permute.xlu1 %v2689_v32  ;;  %2537 = vset.pattern.permute.xlu0 %v2689_v32  ;;  %2539 = vrcp.f32 %v3131_v28  ;;  %v3143_v33 = vld [vmem:[#allocation4 + $0x18] sm:$0xff]  ;;  %v3145_v34 = vld [vmem:[#allocation4 + $0x10] sm:$0xff] }
 0x40e   : > { %2541 = vrcp.f32 %v3133_v27  ;;  %v1640_v5 = vld [vmem:[%s3410_s23 + $0x78] sm:$0xff]  ;;  %v1639_v11 = vld [vmem:[%s3410_s23 + $0x70] sm:$0xff]  ;;  %v1638_v36 = vld [vmem:[%s3410_s23 + $0x68] sm:$0xff] }
 0x40f   : > { %2543 = vrcp.f32 %v3135_v30  ;;  %2288 = vmatprep.subr.mxu0 %v1640_v5  ;;  %2346 = vmatprep.subr.mxu1 %v1640_v5  ;;  %v3158_v35 = vld [vmem:[#allocation4 + $0x58] sm:$0xff]  ;;  %v3160_v39 = vld [vmem:[#allocation4 + $0x40] sm:$0xff]  ;;  %v3172_v9 = vld [vmem:[#allocation4 + $0x48] sm:$0xff] }
 0x410   : > { %2545 = vrcp.f32 %v3138_v31  ;;  %2289 = vmatpush3.msra.mxu0 %v1640_v5  ;;  %2362 = vmatpush3.msra.mxu1 %v1640_v5  ;;  %v1637_v43 = vld [vmem:[%s3410_s23 + $0x60] sm:$0xff]  ;;  %v1636_v44 = vld [vmem:[%s3410_s23 + $0x58] sm:$0xff]  ;;  %v1635_v15 = vld [vmem:[%s3410_s23 + $0x50] sm:$0xff] }
 0x411   : > { %2547 = vrcp.f32 %v3143_v33  ;;  %2290 = vmatprep.subr.mxu0 %v1639_v11  ;;  %2347 = vmatprep.subr.mxu1 %v1639_v11  ;;  %v3170_v37 = vld [vmem:[#allocation4] sm:$0xff]  ;;  %v1634_v48 = vld [vmem:[%s3410_s23 + $0x48] sm:$0xff]  ;;  %v3184_v23 = vld [vmem:[#allocation4 + $0x30] sm:$0xff] }
 0x412   : > { %2549 = vrcp.f32 %v3145_v34  ;;  %2291 = vmatpush3.msra.mxu0 %v1639_v11  ;;  %2363 = vmatpush3.msra.mxu1 %v1639_v11  ;;  %v3182_v17 = vld [vmem:[#allocation4 + $0x8] sm:$0xff]  ;;  %v1633_v51 = vld [vmem:[%s3410_s23 + $0x40] sm:$0xff]  ;;  %v1632_v52 = vld [vmem:[%s3410_s23 + $0x38] sm:$0xff] }
 0x413   : > { %2292 = vmatprep.subr.mxu0 %v1638_v36  ;;  %2348 = vmatprep.subr.mxu1 %v1638_v36  ;;  %2551 = vrcp.f32 %v3158_v35  ;;  %v3194_v25 = vld [vmem:[#allocation4 + $0x60] sm:$0xff]  ;;  %v3196_v46 = vld [vmem:[#allocation4 + $0x70] sm:$0xff]  ;;  %v3205_v63 = vld [vmem:[#allocation4 + $0x38] sm:$0xff] }
 0x414   : > { %2293 = vmatpush3.msra.mxu0 %v1638_v36  ;;  %2364 = vmatpush3.msra.mxu1 %v1638_v36  ;;  %2553 = vrcp.f32 %v3160_v39  ;;  %v1631_v49 = vld [vmem:[%s3410_s23 + $0x30] sm:$0xff]  ;;  %v1630_v53 = vld [vmem:[%s3410_s23 + $0x28] sm:$0xff]  ;;  %v1629_v42 = vld [vmem:[%s3410_s23 + $0x20] sm:$0xff] }
 0x415   : > { %2294 = vmatprep.subr.mxu0 %v1637_v43  ;;  %2349 = vmatprep.subr.mxu1 %v1637_v43  ;;  %2555 = vrcp.f32 %v3170_v37  ;;  %v3203_v50 = vld [vmem:[#allocation4 + $0x50] sm:$0xff]  ;;  %v1628_v2 = vld [vmem:[%s3410_s23 + $0x18] sm:$0xff]  ;;  %v1626_v59 = vld [vmem:[%s3410_s23 + $0x8] sm:$0xff] }
 0x416   : > { %2295 = vmatpush3.msra.mxu0 %v1637_v43  ;;  %2365 = vmatpush3.msra.mxu1 %v1637_v43  ;;  %2557 = vrcp.f32 %v3172_v9  ;;  %v1627_v57 = vld [vmem:[%s3410_s23 + $0x10] sm:$0xff]  ;;  %v1625_v7 = vld [vmem:[%s3410_s23] sm:$0xff] }
 0x417   : > { %2296 = vmatprep.subr.mxu0 %v1636_v44  ;;  %2350 = vmatprep.subr.mxu1 %v1636_v44  ;;  %2559 = vrcp.f32 %v3182_v17 }
 0x418   : > { %2297 = vmatpush3.msra.mxu0 %v1636_v44  ;;  %2366 = vmatpush3.msra.mxu1 %v1636_v44  ;;  %2561 = vrcp.f32 %v3184_v23 }
 0x419   : > { %2298 = vmatprep.subr.mxu0 %v1635_v15  ;;  %2351 = vmatprep.subr.mxu1 %v1635_v15  ;;  %2563 = vrcp.f32 %v3194_v25 }
 0x41a   : > { %v2540_v47 = vpop.eup %2539  ;;  %2299 = vmatpush3.msra.mxu0 %v1635_v15  ;;  %2367 = vmatpush3.msra.mxu1 %v1635_v15  ;;  %2565 = vrcp.f32 %v3196_v46 }
 0x41b   : > { %v2542_v40 = vpop.eup %2541  ;;  %1536 = vperm.xlu1 %2538, %v2540_v47   ;;  %2300 = vmatprep.subr.mxu0 %v1634_v48  ;;  %2567 = vrcp.f32 %v3203_v50  ;;  %v3246_v47 = vld [vmem:[%s3411_s5] ss:$0 sm:$0xff] }
 0x41c   : > { %v2544_v41 = vpop.eup %2543  ;;  %1531 = vperm.xlu0 %2537, %v2542_v40   ;;  %2301 = vmatpush3.msra.mxu0 %v1634_v48  ;;  %2569 = vrcp.f32 %v3205_v63 }
 0x41d   : > { %v2546_v45 = vpop.eup %2545  ;;  %2302 = vmatprep.subr.mxu0 %v1633_v51  ;;  %2352 = vmatprep.subr.mxu1 %v1634_v48 }
 0x41e   : > { %v2548_v56 = vpop.eup %2547  ;;  %2303 = vmatpush3.msra.mxu0 %v1633_v51  ;;  %2368 = vmatpush3.msra.mxu1 %v1634_v48  ;;  %v1794_v48 = vld [vmem:[%s2851_s20 + $0x8] sm:$0xff] }
 0x41f   : > { %1576 = vperm.xlu1 %2538, %v2544_v41   ;;  %v2550_v38 = vpop.eup %2549  ;;  %2304 = vmatprep.subr.mxu0 %v1632_v52 }
 0x420   : > { %1571 = vperm.xlu0 %2537, %v2546_v45   ;;  %v2552_v60 = vpop.eup %2551  ;;  %2305 = vmatpush3.msra.mxu0 %v1632_v52 }
 0x421   : > { %v2554_v62 = vpop.eup %2553  ;;  %2353 = vmatprep.subr.mxu1 %v1633_v51  ;;  %2306 = vmatprep.subr.mxu0 %v1631_v49 }
 0x422   : > { %2369 = vmatpush3.msra.mxu1 %v1633_v51  ;;  %2307 = vmatpush3.msra.mxu0 %v1631_v49  ;;  %v2556_v55 = vpop.eup %2555 }
 0x423   : > { %1581 = vperm.xlu1 %2538, %v2548_v56   ;;  %2354 = vmatprep.subr.mxu1 %v1632_v52  ;;  %v2558_v1 = vpop.eup %2557  ;;  %v3260_v56 = vld [vmem:[%s3413_s2] ss:$0 sm:$0xff] }
 0x424   : > { %1541 = vperm.xlu0 %2537, %v2550_v38   ;;  %2308 = vmatprep.subr.mxu0 %v1630_v53  ;;  %v2560_v54 = vpop.eup %2559  ;;  %v1802_v38 = vld [vmem:[%s2851_s20 + $0x48] sm:$0xff] }
 0x425   : > { %2370 = vmatpush3.msra.mxu1 %v1632_v52  ;;  %2309 = vmatpush3.msra.mxu0 %v1630_v53  ;;  %v2562_v4 = vpop.eup %2561 }
 0x426   : > { %2355 = vmatprep.subr.mxu1 %v1631_v49  ;;  %2310 = vmatprep.subr.mxu0 %v1629_v42  ;;  %v2564_v58 = vpop.eup %2563 }
 0x427   : > { %1586 = vperm.xlu1 %2538, %v2552_v60   ;;  %2371 = vmatpush3.msra.mxu1 %v1631_v49  ;;  %v2566_v3 = vpop.eup %2565 }
 0x428   : > { %1546 = vperm.xlu0 %2537, %v2554_v62   ;;  %2311 = vmatpush3.msra.mxu0 %v1629_v42  ;;  %v2568_v8 = vpop.eup %2567  ;;  %v1801_v62 = vld [vmem:[%s2851_s20 + $0x40] sm:$0xff] }
 0x429   : > { %2356 = vmatprep.subr.mxu1 %v1630_v53  ;;  %2312 = vmatprep.subr.mxu0 %v1628_v2  ;;  %v2570_v6 = vpop.eup %2569 }
 0x42a   : > { %2372 = vmatpush3.msra.mxu1 %v1630_v53  ;;  %2313 = vmatpush3.msra.mxu0 %v1628_v2 }
 0x42b   : > { %1591 = vperm.xlu1 %2538, %v2556_v55   ;;  %2357 = vmatprep.subr.mxu1 %v1629_v42 }
 0x42c   : > { %1551 = vperm.xlu0 %2537, %v2558_v1   ;;  %2314 = vmatprep.subr.mxu0 %v1627_v57 }
 0x42d   : > { %2373 = vmatpush3.msra.mxu1 %v1629_v42  ;;  %2315 = vmatpush3.msra.mxu0 %v1627_v57 }
 0x42e   : > { %2358 = vmatprep.subr.mxu1 %v1628_v2  ;;  %2316 = vmatprep.subr.mxu0 %v1626_v59 }
 0x42f   : > { %1596 = vperm.xlu1 %2538, %v2560_v54   ;;  %2374 = vmatpush3.msra.mxu1 %v1628_v2 }
 0x430   : > { %1556 = vperm.xlu0 %2537, %v2562_v4   ;;  %2317 = vmatpush3.msra.mxu0 %v1626_v59 }
 0x431   : > { %2359 = vmatprep.subr.mxu1 %v1627_v57  ;;  %2318 = vmatprep.subr.mxu0 %v1625_v7 }
 0x432   : > { %2375 = vmatpush3.msra.mxu1 %v1627_v57  ;;  %2319 = vmatpush3.msra.mxu0 %v1625_v7 }
 0x433   : > { %1601 = vperm.xlu1 %2538, %v2564_v58   ;;  %2360 = vmatprep.subr.mxu1 %v1626_v59 }
 0x434   : > { %1561 = vperm.xlu0 %2537, %v2566_v3   ;;  %2376 = vmatpush3.msra.mxu1 %v1626_v59  ;;  %v1804_v59 = vld [vmem:[%s2851_s20 + $0x58] sm:$0xff] }
 0x435   : > { %2361 = vmatprep.subr.mxu1 %v1625_v7 }
 0x436   : > { %2377 = vmatpush3.msra.mxu1 %v1625_v7 }
 0x437   : > { %1606 = vperm.xlu1 %2538, %v2568_v8  }
 0x438   : > { %1566 = vperm.xlu0 %2537, %v2570_v6   ;;  %v1796_v6 = vld [vmem:[%s2851_s20 + $0x18] sm:$0xff] }
 0x496   : > { %v1537_v10 = vpop.permute.xlu1 %1536 }
 0x497   : > { %v1610_v12 = vmul.f32 %v1537_v10, %v3131_v28  ;;  %v1532_v13 = vpop.permute.xlu0 %1531 }
 0x498   : > { %v1609_v14 = vmul.f32 %v1532_v13, %v3133_v27 }
 0x49a   : > { %2320 = vmatprep.mubr.f32.mxu0 %v1609_v14  ;;  %v1577_v16 = vpop.permute.xlu1 %1576  ;;  %v1803_v14 = vld [vmem:[%s2851_s20 + $0x50] sm:$0xff] }
 0x49b   : > { %v1618_v18 = vmul.f32 %v1577_v16, %v3135_v30  ;;  %2321 = vmatmul.mubr.f32.vlgmr.msra.gmra.mxu0 %v1610_v12  ;;  %v1572_v19 = vpop.permute.xlu0 %1571 }
 0x49c   : > { %v1617_v20 = vmul.f32 %v1572_v19, %v3138_v31 }
 0x49e   : > { %2332 = vmatprep.mubr.f32.mxu1 %v1617_v20  ;;  %v1582_v21 = vpop.permute.xlu1 %1581 }
 0x49f   : > { %v1619_v22 = vmul.f32 %v1582_v21, %v3143_v33  ;;  %2333 = vmatmul.mubr.f32.vlgmr.msra.gmra.mxu1 %v1618_v18  ;;  %v1542_v61 = vpop.permute.xlu0 %1541  ;;  %v1795_v21 = vld [vmem:[%s2851_s20 + $0x10] sm:$0xff] }
 0x4a0   : > { %v1611_v0 = vmul.f32 %v1542_v61, %v3145_v34 }
 0x4a1   : > { %2335 = vmatprep.mubr.f32.mxu1 %v1619_v22 }
 0x4a2   : > { %2323 = vmatprep.mubr.f32.mxu0 %v1611_v0  ;;  %v1587_v24 = vpop.permute.xlu1 %1586 }
 0x4a3   : > { %v1620_v29 = vmul.f32 %v1587_v24, %v3158_v35  ;;  %v1547_v26 = vpop.permute.xlu0 %1546 }
 0x4a4   : > { %v1612_v28 = vmul.f32 %v1547_v26, %v3160_v39 }
 0x4a5   : > { %2336 = vmatmul.mubr.f32.gmra.mxu1 %v1620_v29 }
 0x4a6   : > { %2324 = vmatmul.mubr.f32.gmra.mxu0 %v1612_v28  ;;  %v1592_v27 = vpop.permute.xlu1 %1591 }
 0x4a7   : > { %v1621_v30 = vmul.f32 %v1592_v27, %v3170_v37  ;;  %v1552_v32 = vpop.permute.xlu0 %1551 }
 0x4a8   : > { %v1613_v31 = vmul.f32 %v1552_v32, %v3172_v9 }
 0x4a9   : > { %2338 = vmatprep.mubr.f32.mxu1 %v1621_v30 }
 0x4aa   : > { %2326 = vmatprep.mubr.f32.mxu0 %v1613_v31  ;;  %v1597_v33 = vpop.permute.xlu1 %1596 }
 0x4ab   : > { %v1622_v34 = vmul.f32 %v1597_v33, %v3182_v17  ;;  %v1557_v5 = vpop.permute.xlu0 %1556  ;;  %v3253_v17 = vld [vmem:[%s3412_s21] ss:$0 sm:$0xff] }
 0x4ac   : > { %v1614_v11 = vmul.f32 %v1557_v5, %v3184_v23  ;;  %v1793_v23 = vld [vmem:[%s2851_s20] sm:$0xff]  ;;  %v1806_v5 = vld [vmem:[%s2851_s20 + $0x68] sm:$0xff] }
 0x4ad   : > { %2339 = vmatmul.mubr.f32.gmra.mxu1 %v1622_v34 }
 0x4ae   : > { %2327 = vmatmul.mubr.f32.gmra.mxu0 %v1614_v11  ;;  %v1602_v36 = vpop.permute.xlu1 %1601 }
 0x4af   : > { %v1623_v35 = vmul.f32 %v1602_v36, %v3194_v25  ;;  %v1562_v39 = vpop.permute.xlu0 %1561 }
 0x4b0   : > { %v1615_v43 = vmul.f32 %v1562_v39, %v3196_v46  ;;  %v1798_v39 = vld [vmem:[%s2851_s20 + $0x28] sm:$0xff] }
 0x4b1   : > { %2341 = vmatprep.mubr.f32.mxu1 %v1623_v35 }
 0x4b2   : > { %2329 = vmatprep.mubr.f32.mxu0 %v1615_v43  ;;  %v1607_v44 = vpop.permute.xlu1 %1606 }
 0x4b3   : > { %v1624_v37 = vmul.f32 %v1607_v44, %v3203_v50  ;;  %v1567_v9 = vpop.permute.xlu0 %1566 }
 0x4b4   : > { %v1616_v15 = vmul.f32 %v1567_v9, %v3205_v63 }
 0x4b5   : > { %2342 = vmatmul.mubr.f32.gmra.mxu1 %v1624_v37 }
 0x4b6   : > { %2330 = vmatmul.mubr.f32.gmra.mxu0 %v1616_v15 }
 0x55b   : > { %v2322_v40 = vpop.f32.mrf.mxu0 }
 0x55c   : > { %v1720_v41 = vadd.f32 %v2322_v40, %v3246_v47  ;;  %v1805_v40 = vld [vmem:[%s2851_s20 + $0x60] sm:$0xff] }
 0x55d   : > { %v1714_v45 = vpop.f32.mrf.mxu0 }
 0x55e   : > { %v1810_v51 = vadd.f32 %v1794_v48, %v1720_v41  ;;  %v1715_v52 = vadd.f32 %v3246_v47, %v1714_v45 }
 0x55f   : > { %v2334_v25 = vpop.f32.mrf.mxu1 }
 0x560   : > { %v1833_v46 = vmul.f32 %v3253_v17, %v1810_v51  ;;  %v1809_v49 = vadd.f32 %v1793_v23, %v1715_v52  ;;  %v1760_v60 = vadd.f32 %v2334_v25, %v3246_v47  ;;  %v1797_v23 = vld [vmem:[%s2851_s20 + $0x20] sm:$0xff] }
 0x561   : > { %v1754_v50 = vpop.f32.mrf.mxu1 }
 0x562   : > { %v1856_v63 = vadd.f32 %v3260_v56, %v1833_v46  ;;  %v1832_v53 = vmul.f32 %v3253_v17, %v1809_v49  ;;  %v1818_v42 = vadd.f32 %v1802_v38, %v1760_v60  ;;  %v1755_v55 = vadd.f32 %v3246_v47, %v1754_v50 }
 0x564   : > { %v1872_v1 = vmax.f32 %v1856_v63, 0.0  ;;  %v1855_v2 = vadd.f32 %v3260_v56, %v1832_v53  ;;  %v1841_v54 = vmul.f32 %v3253_v17, %v1818_v42  ;;  %v1817_v4 = vadd.f32 %v1801_v62, %v1755_v55 }
 0x565   : > { %v2337_v57 = vpop.f32.mrf.mxu1 }
 0x566   : > { %1889 = vst.msk [vmem:[%s2856_s22 + $0x8] sm:$0xff] %vm1887_vm5, %v1872_v1  ;;  %v1871_v58 = vmax.f32 %v1855_v2, 0.0  ;;  %v1864_v3 = vadd.f32 %v3260_v56, %v1841_v54  ;;  %v1840_v7 = vmul.f32 %v3253_v17, %v1817_v4  ;;  %v2325_v8 = vpop.f32.mrf.mxu0  ;;  %v1770_v10 = vadd.f32 %v2337_v57, %v3246_v47  ;;  %v1808_v1 = vld [vmem:[%s2851_s20 + $0x78] sm:$0xff] }
 0x567   : > { %v1730_v12 = vadd.f32 %v2325_v8, %v3246_v47  ;;  %v1764_v13 = vpop.f32.mrf.mxu1  ;;  %v1800_v57 = vld [vmem:[%s2851_s20 + $0x38] sm:$0xff] }
 0x568   : > { %1888 = vst.msk [vmem:[%s2856_s22] sm:$0xff] %vm1887_vm5, %v1871_v58  ;;  %v1880_v16 = vmax.f32 %v1864_v3, 0.0  ;;  %v1863_v18 = vadd.f32 %v3260_v56, %v1840_v7  ;;  %v1820_v19 = vadd.f32 %v1804_v59, %v1770_v10  ;;  %v1724_v20 = vpop.f32.mrf.mxu0  ;;  %v1765_v22 = vadd.f32 %v3246_v47, %v1764_v13 }
 0x569   : > { %v1812_v61 = vadd.f32 %v1796_v6, %v1730_v12  ;;  %v1725_v0 = vadd.f32 %v3246_v47, %v1724_v20  ;;  %v1807_v6 = vld [vmem:[%s2851_s20 + $0x70] sm:$0xff] }
 0x56a   : > { %1897 = vst.msk [vmem:[%s2856_s22 + $0x48] sm:$0xff] %vm1887_vm5, %v1880_v16  ;;  %v1879_v24 = vmax.f32 %v1863_v18, 0.0  ;;  %v1843_v29 = vmul.f32 %v3253_v17, %v1820_v19  ;;  %v1819_v26 = vadd.f32 %v1803_v14, %v1765_v22  ;;  %v1799_v14 = vld [vmem:[%s2851_s20 + $0x30] sm:$0xff] }
 0x56b   : > { %v1835_v28 = vmul.f32 %v3253_v17, %v1812_v61  ;;  %v1811_v27 = vadd.f32 %v1795_v21, %v1725_v0 }
 0x56c   : > { %1896 = vst.msk [vmem:[%s2856_s22 + $0x40] sm:$0xff] %vm1887_vm5, %v1879_v24  ;;  %v1866_v30 = vadd.f32 %v3260_v56, %v1843_v29  ;;  %v1842_v32 = vmul.f32 %v3253_v17, %v1819_v26 }
 0x56d   : > { %v1858_v31 = vadd.f32 %v3260_v56, %v1835_v28  ;;  %v1834_v33 = vmul.f32 %v3253_v17, %v1811_v27  ;;  %v2340_v34 = vpop.f32.mrf.mxu1 }
 0x56e   : > { %v1882_v11 = vmax.f32 %v1866_v30, 0.0  ;;  %v1865_v36 = vadd.f32 %v3260_v56, %v1842_v32  ;;  %v2328_v35 = vpop.f32.mrf.mxu0  ;;  %v1780_v43 = vadd.f32 %v2340_v34, %v3246_v47 }
 0x56f   : > { %v1874_v44 = vmax.f32 %v1858_v31, 0.0  ;;  %v1857_v37 = vadd.f32 %v3260_v56, %v1834_v33  ;;  %v1740_v9 = vadd.f32 %v2328_v35, %v3246_v47  ;;  %v1774_v15 = vpop.f32.mrf.mxu1 }
 0x570   : > { %1899 = vst.msk [vmem:[%s2856_s22 + $0x58] sm:$0xff] %vm1887_vm5, %v1882_v11  ;;  %v1881_v48 = vmax.f32 %v1865_v36, 0.0  ;;  %v1822_v41 = vadd.f32 %v1806_v5, %v1780_v43  ;;  %v1734_v45 = vpop.f32.mrf.mxu0  ;;  %v1775_v51 = vadd.f32 %v3246_v47, %v1774_v15 }
 0x571   : > { %1891 = vst.msk [vmem:[%s2856_s22 + $0x18] sm:$0xff] %vm1887_vm5, %v1874_v44  ;;  %v1873_v52 = vmax.f32 %v1857_v37, 0.0  ;;  %v1814_v25 = vadd.f32 %v1798_v39, %v1740_v9  ;;  %v1735_v38 = vadd.f32 %v3246_v47, %v1734_v45 }
 0x572   : > { %1898 = vst.msk [vmem:[%s2856_s22 + $0x50] sm:$0xff] %vm1887_vm5, %v1881_v48  ;;  %v1845_v46 = vmul.f32 %v3253_v17, %v1822_v41  ;;  %v1821_v49 = vadd.f32 %v1805_v40, %v1775_v51 }
 0x573   : > { %1890 = vst.msk [vmem:[%s2856_s22 + $0x10] sm:$0xff] %vm1887_vm5, %v1873_v52  ;;  %v1837_v60 = vmul.f32 %v3253_v17, %v1814_v25  ;;  %v1813_v50 = vadd.f32 %v1797_v23, %v1735_v38 }
 0x574   : > { %v1868_v62 = vadd.f32 %v3260_v56, %v1845_v46  ;;  %v1844_v63 = vmul.f32 %v3253_v17, %v1821_v49 }
 0x575   : > { %v1860_v53 = vadd.f32 %v3260_v56, %v1837_v60  ;;  %v1836_v42 = vmul.f32 %v3253_v17, %v1813_v50  ;;  %v2343_v55 = vpop.f32.mrf.mxu1 }
 0x576   : > { %v1884_v2 = vmax.f32 %v1868_v62, 0.0  ;;  %v1867_v54 = vadd.f32 %v3260_v56, %v1844_v63  ;;  %v2331_v4 = vpop.f32.mrf.mxu0  ;;  %v1790_v59 = vadd.f32 %v2343_v55, %v3246_v47 }
 0x577   : > { %v1876_v58 = vmax.f32 %v1860_v53, 0.0  ;;  %v1859_v3 = vadd.f32 %v3260_v56, %v1836_v42  ;;  %v1750_v7 = vadd.f32 %v2331_v4, %v3246_v47  ;;  %v1784_v8 = vpop.f32.mrf.mxu1 }
 0x578   : > { %1901 = vst.msk [vmem:[%s2856_s22 + $0x68] sm:$0xff] %vm1887_vm5, %v1884_v2  ;;  %v1883_v10 = vmax.f32 %v1867_v54, 0.0  ;;  %v1824_v12 = vadd.f32 %v1808_v1, %v1790_v59  ;;  %v1744_v13 = vpop.f32.mrf.mxu0  ;;  %v1785_v16 = vadd.f32 %v3246_v47, %v1784_v8 }
 0x579   : > { %1893 = vst.msk [vmem:[%s2856_s22 + $0x28] sm:$0xff] %vm1887_vm5, %v1876_v58  ;;  %v1875_v18 = vmax.f32 %v1859_v3, 0.0  ;;  %v1816_v19 = vadd.f32 %v1800_v57, %v1750_v7  ;;  %v1745_v20 = vadd.f32 %v3246_v47, %v1744_v13 }
 0x57a   : > { %1900 = vst.msk [vmem:[%s2856_s22 + $0x60] sm:$0xff] %vm1887_vm5, %v1883_v10  ;;  %v1847_v21 = vmul.f32 %v3253_v17, %v1824_v12  ;;  %v1823_v22 = vadd.f32 %v1807_v6, %v1785_v16 }
 0x57b   : > { %1892 = vst.msk [vmem:[%s2856_s22 + $0x20] sm:$0xff] %vm1887_vm5, %v1875_v18  ;;  %v1839_v61 = vmul.f32 %v3253_v17, %v1816_v19  ;;  %v1815_v0 = vadd.f32 %v1799_v14, %v1745_v20 }
 0x57c   : > { %v1870_v24 = vadd.f32 %v3260_v56, %v1847_v21  ;;  %v1846_v29 = vmul.f32 %v3253_v17, %v1823_v22 }
 0x57d   : > { %v1862_v26 = vadd.f32 %v3260_v56, %v1839_v61  ;;  %v1838_v47 = vmul.f32 %v3253_v17, %v1815_v0 }
 0x57e   : > { %v1886_v28 = vmax.f32 %v1870_v24, 0.0  ;;  %v1869_v27 = vadd.f32 %v3260_v56, %v1846_v29 }
 0x57f   : > { %v1878_v30 = vmax.f32 %v1862_v26, 0.0  ;;  %v1861_v32 = vadd.f32 %v3260_v56, %v1838_v47 }
 0x580   : > { %1903 = vst.msk [vmem:[%s2856_s22 + $0x78] sm:$0xff] %vm1887_vm5, %v1886_v28  ;;  %v1885_v31 = vmax.f32 %v1869_v27, 0.0 }
 0x581   : > { %1895 = vst.msk [vmem:[%s2856_s22 + $0x38] sm:$0xff] %vm1887_vm5, %v1878_v30  ;;  %v1877_v33 = vmax.f32 %v1861_v32, 0.0 }
 0x582   : > { %1902 = vst.msk [vmem:[%s2856_s22 + $0x70] sm:$0xff] %vm1887_vm5, %v1885_v31 }
 0x583   : > { %1894 = vst.msk [vmem:[%s2856_s22 + $0x30] sm:$0xff] %vm1887_vm5, %v1877_v33 }
 0x584 PF: > { %s21_s14 = sadd.s32 1, %s2681_s14   ;;  %s3414_s9 = sld [smem:[#allocation8_spill]] }
 0x585   : > { %p18_p13 = scmp.ge.s32.totalorder %s21_s14, 18   ;;  %s3415_s20 = sld [smem:[#allocation9_spill]] }
 0x586   : > { %s3416_s12 = sld [smem:[#allocation10_spill]]  ;;  %s3417_s27 = smov %s2649_s28 }
 0x587   : > { %s3418_s28 = smov %s2653_s29  ;;  %s3419_s29 = smov %s2817_s7 }
 0x588   : > { %s3420_s30 = smov %s2669_s11  ;;  %s3421_s10 = smov %s2677_s13 }
 0x589   : > { %s3423_s13 = smov %s3433_s18  ;;  %20 = sbr.rel (!%p18_p13) target bundleno = 13 (0xd), region = 103 }
 0x58b   : > { %s3422_s11 = smov %s3415_s20 }
 0x58e   :  { %1934 = vsyncpa [#allocation6], 1 }
 0x58f   :  { %1936 = vsyncpa [#allocation6 + $0x1], 1 }

</bundles_post_ra>
